<compile_context>
chip_gen: v6e
topology: v6e:2x2x1
jax: 0.10.0
libtpu: 0.0.40
codegen_flags: <defaults>
</compile_context>

<pallas_src>
import functools
import math

import jax
import jax.numpy as jnp
from jax import lax
from jax.experimental import pallas as pl
from jax.experimental.pallas import tpu as pltpu

_NEG_BIG = 1e9  # additive penalty disabling padded columns (finite, exp -> 0)


def _supcon_kernel(feat_r_ref, feat_c_ref, lab_r_ref, lab_c_ref, colmask_ref,
                   iou_ref, losskeep_ref, keep_ref,
                   m_run, l_run, s_pos, n_pos, *,
                   inv_temperature, iou_threshold, reweight_func):
    k = pl.program_id(1)
    nk = pl.num_programs(1)

    fr = feat_r_ref[...]                 # [TR, Kp]  row-block features
    fc = feat_c_ref[...]                 # [TC, Kp]  col-block features
    col_mask = colmask_ref[...]          # [1, TC]   f32: 1=valid col, 0=padding

    @pl.when(k == 0)
    def _init():
        m_run[...] = jnp.full_like(m_run, -jnp.inf)
        l_run[...] = jnp.zeros_like(l_run)
        s_pos[...] = jnp.zeros_like(s_pos)
        n_pos[...] = jnp.zeros_like(n_pos)

    # Raw (unshifted) similarities for this column block. dot_general contracts
    # the K axis of both operands directly -> no explicit feature transpose.
    sim = lax.dot_general(fr, fc, (((1,), (1,)), ((), ())),
                          preferred_element_type=jnp.float32)
    sim = sim * inv_temperature + (col_mask - 1.0) * _NEG_BIG      # [TR, TC]

    # ---- online log-sum-exp over column blocks -----------------------------
    m_prev = m_run[...]
    m_new = jnp.maximum(m_prev, jnp.max(sim, axis=1, keepdims=True))
    alpha = jnp.exp(m_prev - m_new)
    p = jnp.exp(sim - m_new)                                       # pad cols -> 0
    l_run[...] = alpha * l_run[...] + jnp.sum(p, axis=1, keepdims=True)
    m_run[...] = m_new

    # ---- positives: label equality restricted to valid columns -------------
    lmask = jnp.where(lab_r_ref[...] == lab_c_ref[...], col_mask, 0.0)  # [TR,TC]
    s_pos[...] += jnp.sum(sim * lmask, axis=1, keepdims=True)
    n_pos[...] += jnp.sum(lmask, axis=1, keepdims=True)

    # ---- finalize this row block after the last column block ---------------
    @pl.when(k == nk - 1)
    def _finalize():
        # Raw diagonal sim[i,i] = ||f_i||^2 / T, computed on the same (possibly
        # bf16-rounded) values the MXU saw so the diagonal cancels cleanly.
        fr32 = fr.astype(jnp.float32)
        d_raw = jnp.sum(fr32 * fr32, axis=1, keepdims=True) * inv_temperature

        row_max = m_run[...]
        diag_shift = d_raw - row_max                 # sim[i,i] - row_max
        # Partition function excludes the diagonal (torch logits_mask),
        # subtracted analytically instead of via an MxM mask.
        denom = l_run[...] - jnp.exp(diag_shift)
        log_denom = jnp.log(denom)
        # sum_{j!=i, label match} (sim_shifted[i,j] - log_denom)
        num = (s_pos[...] - row_max * n_pos[...]) - diag_shift \
              - log_denom * (n_pos[...] - 1.0)
        den = jnp.maximum(n_pos[...], 1.0)           # torch denom (incl. diag)
        per_label = num / den

        ious = iou_ref[...]
        keep = (ious >= iou_threshold).astype(jnp.float32)
        if reweight_func == 'none':
            coef = jnp.ones_like(ious)
        elif reweight_func == 'linear':
            coef = ious
        elif reweight_func == 'exp':
            coef = jnp.exp(ious) - 1.0
        else:
            raise ValueError(f"unknown reweight_func: {reweight_func}")

        losskeep_ref[...] = (-per_label * coef) * keep
        keep_ref[...] = keep


def _round_up(x, n):
    return ((x + n - 1) // n) * n


def supcon_loss(features, labels, ious, *, temperature=0.2, iou_threshold=0.5,
                reweight_func='none', block_m=512, block_n=512,
                matmul_dtype=jnp.bfloat16, vmem_limit_bytes=None):
    """features: [M, K], labels: [M] int, ious: [M] float -> scalar loss.

    Defaults (512x512 tiles, bf16 MXU inputs with f32 accumulation) target
    production-size M (e.g. 8192): ~256 grid steps and ~8-10 MiB of VMEM, safe
    under the default scoped-VMEM limit on v5e/v6e/v7x.  block_n can be raised
    further (with vmem_limit_bytes) on v6e; pass jnp.float32 for exact f32 math.
    """
    m, kdim = features.shape
    labels = labels.reshape(-1)
    ious = ious.reshape(-1)

    lcm = math.lcm(block_m, block_n)
    mp = _round_up(m, lcm)
    kp = _round_up(max(kdim, 1), 128)

    # Lane-aligned, padded inputs. Zero feature padding leaves dot products
    # unchanged; padded rows/cols are neutralized in-kernel (bias + masks).
    feats_p = jnp.zeros((mp, kp), matmul_dtype).at[:m, :kdim].set(
        features.astype(matmul_dtype))
    labels_row = jnp.full((mp, 1), -1, jnp.int32).at[:m, 0].set(
        labels.astype(jnp.int32))
    labels_col = labels_row.reshape(1, mp)            # host-side "transpose" (free)
    iou_pad = min(float(iou_threshold), 0.0) - 1.0    # guaranteed below threshold
    ious_p = jnp.full((mp, 1), iou_pad, jnp.float32).at[:m, 0].set(
        ious.astype(jnp.float32))
    col_mask = (jnp.arange(mp, dtype=jnp.int32) < m).astype(
        jnp.float32).reshape(1, mp)

    grid = (mp // block_m, mp // block_n)

    kernel = functools.partial(
        _supcon_kernel,
        inv_temperature=float(1.0 / temperature),
        iou_threshold=float(iou_threshold),
        reweight_func=reweight_func,
    )

    loss_keep, keep = pl.pallas_call(
        kernel,
        out_shape=(jax.ShapeDtypeStruct((mp, 1), jnp.float32),
                   jax.ShapeDtypeStruct((mp, 1), jnp.float32)),
        grid_spec=pltpu.PrefetchScalarGridSpec(
            num_scalar_prefetch=0,
            grid=grid,
            in_specs=[
                pl.BlockSpec((block_m, kp), lambda i, j: (i, 0)),   # row features
                pl.BlockSpec((block_n, kp), lambda i, j: (j, 0)),   # col features
                pl.BlockSpec((block_m, 1), lambda i, j: (i, 0)),    # labels (rows)
                pl.BlockSpec((1, block_n), lambda i, j: (0, j)),    # labels (cols)
                pl.BlockSpec((1, block_n), lambda i, j: (0, j)),    # col validity
                pl.BlockSpec((block_m, 1), lambda i, j: (i, 0)),    # ious
            ],
            out_specs=[
                pl.BlockSpec((block_m, 1), lambda i, j: (i, 0)),    # loss*keep
                pl.BlockSpec((block_m, 1), lambda i, j: (i, 0)),    # keep
            ],
            scratch_shapes=[pltpu.VMEM((block_m, 1), jnp.float32)] * 4,
        ),
        compiler_params=pltpu.CompilerParams(
            dimension_semantics=("parallel", "arbitrary"),
            vmem_limit_bytes=vmem_limit_bytes),
    )(feats_p, feats_p, labels_row, labels_col, col_mask, ious_p)

    # Tiny final reduction in the wrapper (NaN if nothing kept, same as torch).
    return jnp.sum(loss_keep) / jnp.sum(keep)


def _supcon_ref(features, labels, ious, *, temperature=0.2, iou_threshold=0.5,
                reweight_func='none'):
    """Pure-JAX f32 reference mirroring the PyTorch forward."""
    labels = labels.reshape(-1, 1)
    label_mask = (labels == labels.T).astype(jnp.float32)
    sim = (features @ features.T) / temperature
    sim = sim - jnp.max(sim, axis=1, keepdims=True)
    m = features.shape[0]
    logits_mask = 1.0 - jnp.eye(m, dtype=jnp.float32)
    exp_sim = jnp.exp(sim) * logits_mask
    log_prob = sim - jnp.log(exp_sim.sum(axis=1, keepdims=True))
    per_label = (log_prob * logits_mask * label_mask).sum(1) / label_mask.sum(1)
    keep = (ious >= iou_threshold).astype(jnp.float32)
    if reweight_func == 'none':
        coef = jnp.ones_like(ious)
    elif reweight_func == 'linear':
        coef = ious
    else:
        coef = jnp.exp(ious) - 1.0
    loss = -per_label * coef
    return jnp.sum(loss * keep) / jnp.sum(keep)


if __name__ == "__main__":
    # Small, deterministic demo. Explicit 128x128 tiles exercise the
    # multi-block online-LSE path AND row/column/feature padding (200 -> 256,
    # 96 -> 128); a default-tile run exercises the production config.
    M, K = 200, 96
    key = jax.random.PRNGKey(0)
    kf, kl, ki = jax.random.split(key, 3)

    feats = jax.random.normal(kf, (M, K), dtype=jnp.float32)
    feats = feats / jnp.linalg.norm(feats, axis=1, keepdims=True)  # cosine feats
    labels = jax.random.randint(kl, (M,), 0, 5, dtype=jnp.int32)
    ious = jax.random.uniform(ki, (M,), dtype=jnp.float32)
    ious = ious.at[0].set(0.9)  # guarantee at least one kept proposal

    # Reference on bf16-rounded features (isolates kernel math from the
    # intentional bf16 MXU rounding) and the pure-f32 reference (loose check).
    feats_bf16 = feats.astype(jnp.bfloat16).astype(jnp.float32)

    for rw in ('none', 'linear', 'exp'):
        out = supcon_loss(feats, labels, ious, temperature=0.2,
                          iou_threshold=0.5, reweight_func=rw,
                          block_m=128, block_n=128)
        out = jax.block_until_ready(out)
        ref_tight = _supcon_ref(feats_bf16, labels, ious, temperature=0.2,
                                iou_threshold=0.5, reweight_func=rw)
        ref_f32 = _supcon_ref(feats, labels, ious, temperature=0.2,
                              iou_threshold=0.5, reweight_func=rw)
        assert bool(jnp.allclose(out, ref_tight, rtol=1e-3, atol=1e-3)), \
            (rw, float(out), float(ref_tight))
        assert bool(jnp.allclose(out, ref_f32, rtol=3e-2, atol=3e-2)), \
            (rw, float(out), float(ref_f32))

    # Production-default tiles (512x512): single padded block here, but runs
    # the exact config used at large M.
    out_def = supcon_loss(feats, labels, ious, temperature=0.2,
                          iou_threshold=0.5, reweight_func='none')
    out_def = jax.block_until_ready(out_def)
    ref_def = _supcon_ref(feats_bf16, labels, ious, temperature=0.2,
                          iou_threshold=0.5, reweight_func='none')
    assert bool(jnp.allclose(out_def, ref_def, rtol=1e-3, atol=1e-3)), \
        (float(out_def), float(ref_def))

    print("KERNEL_OK")
</pallas_src>

<mosaic_0001>
module attributes {stable_mosaic.version = 11 : i64} {
  func.func @_supcon_kernel(%arg0: i32, %arg1: i32, %arg2: memref<128x128xbf16, #tpu.memory_space<vmem>>, %arg3: memref<128x128xbf16, #tpu.memory_space<vmem>>, %arg4: memref<128x1xi32, #tpu.memory_space<vmem>>, %arg5: memref<1x128xi32, #tpu.memory_space<vmem>>, %arg6: memref<1x128xf32, #tpu.memory_space<vmem>>, %arg7: memref<128x1xf32, #tpu.memory_space<vmem>>, %arg8: memref<128x1xf32, #tpu.memory_space<vmem>>, %arg9: memref<128x1xf32, #tpu.memory_space<vmem>>, %arg10: memref<128x1xf32, #tpu.memory_space<vmem>>, %arg11: memref<128x1xf32, #tpu.memory_space<vmem>>, %arg12: memref<128x1xf32, #tpu.memory_space<vmem>>, %arg13: memref<128x1xf32, #tpu.memory_space<vmem>>) attributes {dimension_semantics = [#tpu.dimension_semantics<parallel>, #tpu.dimension_semantics<arbitrary>], iteration_bounds = array<i64: 2, 2>, scalar_prefetch = 0 : i64, scratch_operands = 4 : i64, tpu.core_type = #tpu.core_type<tc>, window_params = [{transform_indices = @transform_0, window_bounds = array<i64: 128, 128>}, {transform_indices = @transform_1, window_bounds = array<i64: 128, 128>}, {transform_indices = @transform_2, window_bounds = array<i64: 128, 1>}, {transform_indices = @transform_3, window_bounds = array<i64: 1, 128>}, {transform_indices = @transform_4, window_bounds = array<i64: 1, 128>}, {transform_indices = @transform_5, window_bounds = array<i64: 128, 1>}, {transform_indices = @transform_6, window_bounds = array<i64: 128, 1>}, {transform_indices = @transform_7, window_bounds = array<i64: 128, 1>}]} {
    %c0 = arith.constant 0 : index
    %c0_0 = arith.constant 0 : index
    %0 = vector.load %arg2[%c0, %c0_0] : memref<128x128xbf16, #tpu.memory_space<vmem>>, vector<128x128xbf16>
    %c0_1 = arith.constant 0 : index
    %c0_2 = arith.constant 0 : index
    %1 = vector.load %arg3[%c0_1, %c0_2] : memref<128x128xbf16, #tpu.memory_space<vmem>>, vector<128x128xbf16>
    %c0_3 = arith.constant 0 : index
    %c0_4 = arith.constant 0 : index
    %2 = vector.load %arg6[%c0_3, %c0_4] : memref<1x128xf32, #tpu.memory_space<vmem>>, vector<1x128xf32>
    %c0_i32 = arith.constant 0 : i32
    %3 = arith.cmpi eq, %arg1, %c0_i32 : i32
    %4 = arith.extui %3 : i1 to i32
    %c0_i32_5 = arith.constant 0 : i32
    %5 = arith.cmpi ne, %4, %c0_i32_5 : i32
    scf.if %5 {
      %cst_35 = arith.constant 0xFF800000 : f32
      %54 = vector.broadcast %cst_35 : f32 to vector<128x1xf32>
      %c0_36 = arith.constant 0 : index
      %c0_37 = arith.constant 0 : index
      %55 = vector.load %arg10[%c0_36, %c0_37] : memref<128x1xf32, #tpu.memory_space<vmem>>, vector<128x1xf32>
      tpu.vector_store %arg10[%c0_36, %c0_37], %54 {strides = array<i32>} : memref<128x1xf32, #tpu.memory_space<vmem>>, vector<128x1xf32>,
      %cst_38 = arith.constant 0.000000e+00 : f32
      %56 = vector.broadcast %cst_38 : f32 to vector<128x1xf32>
      %c0_39 = arith.constant 0 : index
      %c0_40 = arith.constant 0 : index
      %57 = vector.load %arg11[%c0_39, %c0_40] : memref<128x1xf32, #tpu.memory_space<vmem>>, vector<128x1xf32>
      tpu.vector_store %arg11[%c0_39, %c0_40], %56 {strides = array<i32>} : memref<128x1xf32, #tpu.memory_space<vmem>>, vector<128x1xf32>,
      %cst_41 = arith.constant 0.000000e+00 : f32
      %58 = vector.broadcast %cst_41 : f32 to vector<128x1xf32>
      %c0_42 = arith.constant 0 : index
      %c0_43 = arith.constant 0 : index
      %59 = vector.load %arg12[%c0_42, %c0_43] : memref<128x1xf32, #tpu.memory_space<vmem>>, vector<128x1xf32>
      tpu.vector_store %arg12[%c0_42, %c0_43], %58 {strides = array<i32>} : memref<128x1xf32, #tpu.memory_space<vmem>>, vector<128x1xf32>,
      %cst_44 = arith.constant 0.000000e+00 : f32
      %60 = vector.broadcast %cst_44 : f32 to vector<128x1xf32>
      %c0_45 = arith.constant 0 : index
      %c0_46 = arith.constant 0 : index
      %61 = vector.load %arg13[%c0_45, %c0_46] : memref<128x1xf32, #tpu.memory_space<vmem>>, vector<128x1xf32>
      tpu.vector_store %arg13[%c0_45, %c0_46], %60 {strides = array<i32>} : memref<128x1xf32, #tpu.memory_space<vmem>>, vector<128x1xf32>,
    } else {
    }
    %cst = arith.constant dense<0.000000e+00> : vector<128x128xf32>
    %6 = tpu.matmul %0, %1, %cst {dimension_numbers = #tpu.dot_dimension_numbers<[1], [1], [0], [0], [0, 0, 1, 0], [], []>} : vector<128x128xbf16>, vector<128x128xbf16>, vector<128x128xf32> -> vector<128x128xf32>
    %cst_6 = arith.constant 5.000000e+00 : f32
    %7 = vector.broadcast %cst_6 : f32 to vector<128x128xf32>
    %8 = arith.mulf %6, %7 : vector<128x128xf32>
    %cst_7 = arith.constant 1.000000e+00 : f32
    %9 = vector.broadcast %cst_7 : f32 to vector<1x128xf32>
    %10 = arith.subf %2, %9 : vector<1x128xf32>
    %cst_8 = arith.constant 1.000000e+09 : f32
    %11 = vector.broadcast %cst_8 : f32 to vector<1x128xf32>
    %12 = arith.mulf %10, %11 : vector<1x128xf32>
    %13 = vector.broadcast %12 : vector<1x128xf32> to vector<128x128xf32>
    %14 = arith.addf %8, %13 : vector<128x128xf32>
    %c0_9 = arith.constant 0 : index
    %c0_10 = arith.constant 0 : index
    %15 = vector.load %arg10[%c0_9, %c0_10] : memref<128x1xf32, #tpu.memory_space<vmem>>, vector<128x1xf32>
    %cst_11 = arith.constant dense<0xFF800000> : vector<128xf32>
    %16 = vector.multi_reduction <maximumf>, %14, %cst_11 [1] : vector<128x128xf32> to vector<128xf32>
    %17 = vector.shape_cast %16 : vector<128xf32> to vector<128x1xf32>
    %18 = arith.maximumf %15, %17 : vector<128x1xf32>
    %19 = arith.subf %15, %18 : vector<128x1xf32>
    %20 = math.exp %19 : vector<128x1xf32>
    %21 = vector.broadcast %18 : vector<128x1xf32> to vector<128x128xf32>
    %22 = arith.subf %14, %21 : vector<128x128xf32>
    %23 = math.exp %22 : vector<128x128xf32>
    %c0_12 = arith.constant 0 : index
    %c0_13 = arith.constant 0 : index
    %24 = vector.load %arg11[%c0_12, %c0_13] : memref<128x1xf32, #tpu.memory_space<vmem>>, vector<128x1xf32>
    %25 = arith.mulf %20, %24 : vector<128x1xf32>
    %cst_14 = arith.constant dense<0.000000e+00> : vector<128xf32>
    %26 = vector.multi_reduction <add>, %23, %cst_14 [1] : vector<128x128xf32> to vector<128xf32>
    %27 = vector.shape_cast %26 : vector<128xf32> to vector<128x1xf32>
    %28 = arith.addf %25, %27 : vector<128x1xf32>
    %c0_15 = arith.constant 0 : index
    %c0_16 = arith.constant 0 : index
    %29 = vector.load %arg11[%c0_15, %c0_16] : memref<128x1xf32, #tpu.memory_space<vmem>>, vector<128x1xf32>
    tpu.vector_store %arg11[%c0_15, %c0_16], %28 {strides = array<i32>} : memref<128x1xf32, #tpu.memory_space<vmem>>, vector<128x1xf32>,
    %c0_17 = arith.constant 0 : index
    %c0_18 = arith.constant 0 : index
    %30 = vector.load %arg10[%c0_17, %c0_18] : memref<128x1xf32, #tpu.memory_space<vmem>>, vector<128x1xf32>
    tpu.vector_store %arg10[%c0_17, %c0_18], %18 {strides = array<i32>} : memref<128x1xf32, #tpu.memory_space<vmem>>, vector<128x1xf32>,
    %c0_19 = arith.constant 0 : index
    %c0_20 = arith.constant 0 : index
    %31 = vector.load %arg4[%c0_19, %c0_20] : memref<128x1xi32, #tpu.memory_space<vmem>>, vector<128x1xi32>
    %c0_21 = arith.constant 0 : index
    %c0_22 = arith.constant 0 : index
    %32 = vector.load %arg5[%c0_21, %c0_22] : memref<1x128xi32, #tpu.memory_space<vmem>>, vector<1x128xi32>
    %33 = vector.broadcast %31 : vector<128x1xi32> to vector<128x128xi32>
    %34 = vector.broadcast %32 : vector<1x128xi32> to vector<128x128xi32>
    %35 = arith.cmpi eq, %33, %34 : vector<128x128xi32>
    %cst_23 = arith.constant 0.000000e+00 : f32
    %36 = vector.shape_cast %2 : vector<1x128xf32> to vector<1x128xf32>
    %37 = vector.broadcast %36 : vector<1x128xf32> to vector<128x128xf32>
    %38 = vector.broadcast %cst_23 : f32 to vector<128x128xf32>
    %39 = arith.select %35, %37, %38 : vector<128x128xi1>, vector<128x128xf32>
    %c0_24 = arith.constant 0 : index
    %c0_25 = arith.constant 0 : index
    %40 = vector.load %arg12[%c0_24, %c0_25] : memref<128x1xf32, #tpu.memory_space<vmem>>, vector<128x1xf32>
    %41 = arith.mulf %14, %39 : vector<128x128xf32>
    %cst_26 = arith.constant dense<0.000000e+00> : vector<128xf32>
    %42 = vector.multi_reduction <add>, %41, %cst_26 [1] : vector<128x128xf32> to vector<128xf32>
    %43 = vector.shape_cast %42 : vector<128xf32> to vector<128x1xf32>
    %44 = arith.addf %40, %43 : vector<128x1xf32>
    %c0_27 = arith.constant 0 : index
    %c0_28 = arith.constant 0 : index
    %45 = vector.load %arg12[%c0_27, %c0_28] : memref<128x1xf32, #tpu.memory_space<vmem>>, vector<128x1xf32>
    tpu.vector_store %arg12[%c0_27, %c0_28], %44 {strides = array<i32>} : memref<128x1xf32, #tpu.memory_space<vmem>>, vector<128x1xf32>,
    %c0_29 = arith.constant 0 : index
    %c0_30 = arith.constant 0 : index
    %46 = vector.load %arg13[%c0_29, %c0_30] : memref<128x1xf32, #tpu.memory_space<vmem>>, vector<128x1xf32>
    %cst_31 = arith.constant dense<0.000000e+00> : vector<128xf32>
    %47 = vector.multi_reduction <add>, %39, %cst_31 [1] : vector<128x128xf32> to vector<128xf32>
    %48 = vector.shape_cast %47 : vector<128xf32> to vector<128x1xf32>
    %49 = arith.addf %46, %48 : vector<128x1xf32>
    %c0_32 = arith.constant 0 : index
    %c0_33 = arith.constant 0 : index
    %50 = vector.load %arg13[%c0_32, %c0_33] : memref<128x1xf32, #tpu.memory_space<vmem>>, vector<128x1xf32>
    tpu.vector_store %arg13[%c0_32, %c0_33], %49 {strides = array<i32>} : memref<128x1xf32, #tpu.memory_space<vmem>>, vector<128x1xf32>,
    %c1_i32 = arith.constant 1 : i32
    %51 = arith.cmpi eq, %arg1, %c1_i32 : i32
    %52 = arith.extui %51 : i1 to i32
    %c0_i32_34 = arith.constant 0 : i32
    %53 = arith.cmpi ne, %52, %c0_i32_34 : i32
    scf.if %53 {
      %54 = arith.extf %0 : vector<128x128xbf16> to vector<128x128xf32>
      %55 = arith.mulf %54, %54 : vector<128x128xf32>
      %cst_35 = arith.constant dense<0.000000e+00> : vector<128xf32>
      %56 = vector.multi_reduction <add>, %55, %cst_35 [1] : vector<128x128xf32> to vector<128xf32>
      %57 = vector.shape_cast %56 : vector<128xf32> to vector<128x1xf32>
      %cst_36 = arith.constant 5.000000e+00 : f32
      %58 = vector.broadcast %cst_36 : f32 to vector<128x1xf32>
      %59 = arith.mulf %57, %58 : vector<128x1xf32>
      %c0_37 = arith.constant 0 : index
      %c0_38 = arith.constant 0 : index
      %60 = vector.load %arg10[%c0_37, %c0_38] : memref<128x1xf32, #tpu.memory_space<vmem>>, vector<128x1xf32>
      %61 = arith.subf %59, %60 : vector<128x1xf32>
      %c0_39 = arith.constant 0 : index
      %c0_40 = arith.constant 0 : index
      %62 = vector.load %arg11[%c0_39, %c0_40] : memref<128x1xf32, #tpu.memory_space<vmem>>, vector<128x1xf32>
      %63 = math.exp %61 : vector<128x1xf32>
      %64 = arith.subf %62, %63 : vector<128x1xf32>
      %65 = math.log %64 : vector<128x1xf32>
      %c0_41 = arith.constant 0 : index
      %c0_42 = arith.constant 0 : index
      %66 = vector.load %arg12[%c0_41, %c0_42] : memref<128x1xf32, #tpu.memory_space<vmem>>, vector<128x1xf32>
      %c0_43 = arith.constant 0 : index
      %c0_44 = arith.constant 0 : index
      %67 = vector.load %arg13[%c0_43, %c0_44] : memref<128x1xf32, #tpu.memory_space<vmem>>, vector<128x1xf32>
      %68 = arith.mulf %60, %67 : vector<128x1xf32>
      %69 = arith.subf %66, %68 : vector<128x1xf32>
      %70 = arith.subf %69, %61 : vector<128x1xf32>
      %c0_45 = arith.constant 0 : index
      %c0_46 = arith.constant 0 : index
      %71 = vector.load %arg13[%c0_45, %c0_46] : memref<128x1xf32, #tpu.memory_space<vmem>>, vector<128x1xf32>
      %cst_47 = arith.constant 1.000000e+00 : f32
      %72 = vector.broadcast %cst_47 : f32 to vector<128x1xf32>
      %73 = arith.subf %71, %72 : vector<128x1xf32>
      %74 = arith.mulf %65, %73 : vector<128x1xf32>
      %75 = arith.subf %70, %74 : vector<128x1xf32>
      %c0_48 = arith.constant 0 : index
      %c0_49 = arith.constant 0 : index
      %76 = vector.load %arg13[%c0_48, %c0_49] : memref<128x1xf32, #tpu.memory_space<vmem>>, vector<128x1xf32>
      %cst_50 = arith.constant 1.000000e+00 : f32
      %77 = vector.broadcast %cst_50 : f32 to vector<128x1xf32>
      %78 = arith.maximumf %76, %77 : vector<128x1xf32>
      %79 = arith.divf %75, %78 : vector<128x1xf32>
      %c0_51 = arith.constant 0 : index
      %c0_52 = arith.constant 0 : index
      %80 = vector.load %arg7[%c0_51, %c0_52] : memref<128x1xf32, #tpu.memory_space<vmem>>, vector<128x1xf32>
      %cst_53 = arith.constant 5.000000e-01 : f32
      %81 = vector.broadcast %cst_53 : f32 to vector<128x1xf32>
      %82 = arith.cmpf oge, %80, %81 : vector<128x1xf32>
      %83 = arith.extui %82 : vector<128x1xi1> to vector<128x1xi32>
      %84 = arith.sitofp %83 : vector<128x1xi32> to vector<128x1xf32>
      %cst_54 = arith.constant 1.000000e+00 : f32
      %85 = vector.broadcast %cst_54 : f32 to vector<128x1xf32>
      %cst_55 = arith.constant 0.000000e+00 : f32
      %86 = vector.broadcast %cst_55 : f32 to vector<128x1xf32>
      %87 = arith.subf %86, %79 : vector<128x1xf32>
      %88 = arith.mulf %87, %85 : vector<128x1xf32>
      %89 = arith.mulf %88, %84 : vector<128x1xf32>
      %c0_56 = arith.constant 0 : index
      %c0_57 = arith.constant 0 : index
      %90 = vector.load %arg8[%c0_56, %c0_57] : memref<128x1xf32, #tpu.memory_space<vmem>>, vector<128x1xf32>
      tpu.vector_store %arg8[%c0_56, %c0_57], %89 {strides = array<i32>} : memref<128x1xf32, #tpu.memory_space<vmem>>, vector<128x1xf32>,
      %c0_58 = arith.constant 0 : index
      %c0_59 = arith.constant 0 : index
      %91 = vector.load %arg9[%c0_58, %c0_59] : memref<128x1xf32, #tpu.memory_space<vmem>>, vector<128x1xf32>
      tpu.vector_store %arg9[%c0_58, %c0_59], %84 {strides = array<i32>} : memref<128x1xf32, #tpu.memory_space<vmem>>, vector<128x1xf32>,
    } else {
    }
    return
  }
  func.func @transform_0(%arg0: i32, %arg1: i32) -> (i32, i32) {
    %c0_i32 = arith.constant 0 : i32
    %c0_i32_0 = arith.constant 0 : i32
    return %arg0, %c0_i32 : i32, i32
  }
  func.func @transform_1(%arg0: i32, %arg1: i32) -> (i32, i32) {
    %c0_i32 = arith.constant 0 : i32
    %c0_i32_0 = arith.constant 0 : i32
    return %arg1, %c0_i32 : i32, i32
  }
  func.func @transform_2(%arg0: i32, %arg1: i32) -> (i32, i32) {
    %c0_i32 = arith.constant 0 : i32
    %c0_i32_0 = arith.constant 0 : i32
    return %arg0, %c0_i32 : i32, i32
  }
  func.func @transform_3(%arg0: i32, %arg1: i32) -> (i32, i32) {
    %c0_i32 = arith.constant 0 : i32
    %c0_i32_0 = arith.constant 0 : i32
    return %c0_i32, %arg1 : i32, i32
  }
  func.func @transform_4(%arg0: i32, %arg1: i32) -> (i32, i32) {
    %c0_i32 = arith.constant 0 : i32
    %c0_i32_0 = arith.constant 0 : i32
    return %c0_i32, %arg1 : i32, i32
  }
  func.func @transform_5(%arg0: i32, %arg1: i32) -> (i32, i32) {
    %c0_i32 = arith.constant 0 : i32
    %c0_i32_0 = arith.constant 0 : i32
    return %arg0, %c0_i32 : i32, i32
  }
  func.func @transform_6(%arg0: i32, %arg1: i32) -> (i32, i32) {
    %c0_i32 = arith.constant 0 : i32
    %c0_i32_0 = arith.constant 0 : i32
    return %arg0, %c0_i32 : i32, i32
  }
  func.func @transform_7(%arg0: i32, %arg1: i32) -> (i32, i32) {
    %c0_i32 = arith.constant 0 : i32
    %c0_i32_0 = arith.constant 0 : i32
    return %arg0, %c0_i32 : i32, i32
  }
}

</mosaic_0001>

<bundles_post_ra>
// kernel: tpu_custom_call.1
= control target key start
LH: loop header
LB: loop body
LE: loop exit
PB: predicated region body
PF: predicated region fallthrough
CT: control target
= control target key end

     0   :  { %s2471_s24 = smov 0   ;;  %s2473_s25 = smov 0   ;;  %s3760_s0 = inlined_call_operand.vmem [shape: bf16[256,128], index: 0, kind: input, shape index: {}]   ;;  %s3761_s1 = inlined_call_operand.vmem [shape: bf16[256,128], index: 1, kind: input, shape index: {}]   ;;  %s3762_s2 = inlined_call_operand.vmem [shape: s32[256,1], index: 2, kind: input, shape index: {}]   ;;  %s3763_s3 = inlined_call_operand.vmem [shape: s32[1,256], index: 3, kind: input, shape index: {}]   ;;  %s3764_s4 = inlined_call_operand.vmem [shape: f32[1,256], index: 4, kind: input, shape index: {}]   ;;  %s3765_s5 = inlined_call_operand.vmem [shape: f32[256,1], index: 5, kind: input, shape index: {}]   ;;  %s3766_s6 = inlined_call_operand.vmem [shape: f32[256,1], index: 6, kind: output, shape index: {0}]   ;;  %s3767_s7 = inlined_call_operand.vmem [shape: f32[256,1], index: 7, kind: output, shape index: {1}]  }
   0x1   :  { %s2475_s26 = smov 0   ;;  %s2477_s27 = smov 0  }
   0x2   :  { %s2479_s28 = smov 0  }
   0x3 LB: > { %s27_s29 = sadd.s32 1, %s2417_s26  ;;  %s30_s30 = sadd.s32 1, %s2421_s27  ;;  %s2425_s28 = sphi %s2479_s28, %s18_s28   ;;  %s2421_s27 = sphi %s2477_s27, %s4012_s27   ;;  %s2417_s26 = sphi %s2475_s26, %s4011_s26   ;;  %s2413_s25 = sphi %s2473_s25, %s4010_s25   ;;  %s2409_s24 = sphi %s2471_s24, %s4009_s24  }
   0x4   : > { %p28_p0 = scmp.ge.s32.totalorder %s27_s29, 2  ;;  %p2050_p1 = scmp.ge.s32.totalorder %s2425_s28, 1 }
   0x5   : > { %p302_p2 = scmp.lt.s32.totalorder %s2425_s28, 5 }
   0x6   : > { %s4014_s29 = smov (%p28_p0, %s27_s29), 0  ;;  %s4016_s30 = smov (!%p28_p0, %s30_s30), %s2421_s27 }
   0x7   : > { %p303_p3 = pnand %p2050_p1, %p302_p2  ;;  %p32_p4 = scmp.ge.s32.totalorder %s4016_s30, 2 }
   0x9   : > { %s4018_s30 = smov (%p32_p4, %s4016_s30), 0  ;;  %306 = sbr.rel (%p303_p3) target bundleno = 1092 (0x444), region = 44 }
   0xe   : > { %s2051_s8 = sshll.u32 %s2413_s25, 4  ;;  %s2053_s9 = sshll.u32 %s2409_s24, 4 }
   0xf   : > { %p361_p5 = scmp.lt.s32.totalorder %s2051_s8, 31  ;;  %p367_p6 = scmp.lt.s32.totalorder %s2053_s9, 31 }
  0x10   : > { %p378_p7 = scmp.lt.s32.totalorder %s2409_s24, 1  ;;  %p2063_p8 = scmp.ne.s32.totalorder %s2409_s24, 0 }
  0x11   : > { %s4020_s8 = smov (!%p361_p5, %s2051_s8), 31  ;;  %s4022_s9 = smov (!%p367_p6, %s2053_s9), 31 }
  0x12   : > { %s2052_s10 = sshll.u32 %s4020_s8, 2  ;;  %s2056_s11 = sshll.u32 %s4020_s8, 3 }
  0x13   : > { %s364_s14 = scalar_lea.vmem %s3760_s0, %s2052_s10  ;;  %s2054_s15 = sshll.u32 %s4022_s9, 2 }
  0x14   : > { %s2511_s18 = scalar_lea.vmem %s3761_s1, %s2054_s15  ;;  %s2516_s21 = scalar_lea.vmem %s3762_s2, %s2056_s11  ;;  %v2518_v0 = vld [vmem:[%s364_s14] sm:$0xf]  ;;  %v2520_v1 = vld [vmem:[%s364_s14 + $0x4] sm:$0xf]  ;;  %v2522_v2 = vld [vmem:[%s364_s14 + $0x8] sm:$0xf] }
  0x15   : > { %3834 = vst [vmem:[#allocation6_spill] sm:$0xff] %v2518_v0  ;;  %3835 = vst [vmem:[#allocation7_spill] sm:$0xff] %v2520_v1  ;;  %s2525_s22 = scalar_select %p378_p7, %s2409_s24, 1  ;;  %v2527_v3 = vld [vmem:[%s364_s14 + $0xc] sm:$0xf] }
  0x16   : > { %3836 = vst [vmem:[#allocation8_spill] sm:$0xff] %v2522_v2  ;;  %3837 = vst [vmem:[#allocation9_spill] sm:$0xff] %v2527_v3  ;;  %v2529_v4 = vld [vmem:[%s364_s14 + $0x10] sm:$0xf]  ;;  %s2534_s8 = scalar_lea.vmem %s3765_s5, %s2056_s11  ;;  %s2539_s12 = scalar_lea.vmem %s3766_s6, %s2056_s11  ;;  %v2541_v5 = vld [vmem:[%s364_s14 + $0x14] sm:$0xf] }
  0x17   : > { %3838 = vst [vmem:[#allocation10_spill] sm:$0xff] %v2529_v4  ;;  %3839 = vst [vmem:[#allocation11_spill] sm:$0xff] %v2541_v5  ;;  %v2543_v6 = vld [vmem:[%s364_s14 + $0x18] sm:$0xf]  ;;  %v2545_v7 = vld [vmem:[%s364_s14 + $0x1c] sm:$0xf]  ;;  %s380_s16 = scalar_lea.vmem %s3763_s3, %s2525_s22  ;;  %s2560_s20 = scalar_lea.vmem %s3767_s7, %s2056_s11 }
  0x18   : > { %3840 = vst [vmem:[#allocation12_spill] sm:$0xff] %v2543_v6  ;;  %3841 = vst [vmem:[#allocation13_spill] sm:$0xff] %v2545_v7  ;;  %v2551_v8 = vld [vmem:[%s364_s14 + $0x20] sm:$0xf]  ;;  %v2553_v9 = vld [vmem:[%s364_s14 + $0x24] sm:$0xf] }
  0x19   : > { %3842 = vst [vmem:[#allocation14_spill] sm:$0xff] %v2551_v8  ;;  %3843 = vst [vmem:[#allocation15_spill] sm:$0xff] %v2553_v9  ;;  %v2555_v10 = vld [vmem:[%s364_s14 + $0x28] sm:$0xf]  ;;  %v2562_v11 = vld [vmem:[%s364_s14 + $0x2c] sm:$0xf] }
  0x1a   : > { %3844 = vst [vmem:[#allocation16_spill] sm:$0xff] %v2555_v10  ;;  %3845 = vst [vmem:[#allocation17_spill] sm:$0xff] %v2562_v11  ;;  %v2564_v12 = vld [vmem:[%s364_s14 + $0x30] sm:$0xf]  ;;  %v2566_v13 = vld [vmem:[%s364_s14 + $0x34] sm:$0xf] }
  0x1b   : > { %3846 = vst [vmem:[#allocation18_spill] sm:$0xff] %v2564_v12  ;;  %3847 = vst [vmem:[#allocation19_spill] sm:$0xff] %v2566_v13  ;;  %v2568_v14 = vld [vmem:[%s364_s14 + $0x38] sm:$0xf]  ;;  %v2570_v15 = vld [vmem:[%s364_s14 + $0x3c] sm:$0xf]  ;;  %s383_s14 = scalar_lea.vmem %s3764_s4, %s2525_s22 }
  0x1c   : > { %3848 = vst [vmem:[#allocation20_spill] sm:$0xff] %v2568_v14  ;;  %3849 = vst [vmem:[#allocation21_spill] sm:$0xff] %v2570_v15  ;;  %v2573_v16 = vld [vmem:[%s2511_s18] sm:$0xf]  ;;  %v2576_v17 = vld [vmem:[%s2511_s18 + $0x4] sm:$0xf] }
  0x1d   : > { %v2579_v18 = vld [vmem:[%s2511_s18 + $0x8] sm:$0xf]  ;;  %v2582_v19 = vld [vmem:[%s2511_s18 + $0xc] sm:$0xf]  ;;  %v2585_v20 = vld [vmem:[%s2511_s18 + $0x10] sm:$0xf] }
  0x1e   : > { %v2588_v21 = vld [vmem:[%s2511_s18 + $0x14] sm:$0xf]  ;;  %v2591_v22 = vld [vmem:[%s2511_s18 + $0x18] sm:$0xf]  ;;  %v2598_v23 = vld [vmem:[%s2511_s18 + $0x1c] sm:$0xf] }
  0x1f   : > { %v2601_v24 = vld [vmem:[%s2511_s18 + $0x20] sm:$0xf]  ;;  %v2604_v25 = vld [vmem:[%s2511_s18 + $0x24] sm:$0xf]  ;;  %v2607_v26 = vld [vmem:[%s2511_s18 + $0x28] sm:$0xf] }
  0x20   : > { %v2610_v27 = vld [vmem:[%s2511_s18 + $0x2c] sm:$0xf]  ;;  %v2613_v28 = vld [vmem:[%s2511_s18 + $0x30] sm:$0xf]  ;;  %v2616_v29 = vld [vmem:[%s2511_s18 + $0x34] sm:$0xf] }
  0x21   : > { %v2619_v30 = vld [vmem:[%s2511_s18 + $0x38] sm:$0xf]  ;;  %v2622_v31 = vld [vmem:[%s2511_s18 + $0x3c] sm:$0xf]  ;;  %v2624_v32 = vld [vmem:[%s383_s14] sm:$0x1] }
  0x22   : > { %439 = sbr.rel (%p2063_p8) target bundleno = 72 (0x48), region = 48 }
  0x27   : > { %vm440_vm0 = vcmask 7168   ;;  %v2427_v33 = vmov -inf   ;;  %v2428_v34 = vmov 0.0  }
  0x28   : > { %441 = vst.msk [vmem:[#allocation2] sm:$0xff] %vm440_vm0, %v2427_v33  ;;  %442 = vst.msk [vmem:[#allocation2 + $0x8] sm:$0xff] %vm440_vm0, %v2427_v33 }
  0x29   : > { %443 = vst.msk [vmem:[#allocation2 + $0x10] sm:$0xff] %vm440_vm0, %v2427_v33  ;;  %444 = vst.msk [vmem:[#allocation2 + $0x18] sm:$0xff] %vm440_vm0, %v2427_v33 }
  0x2a   : > { %445 = vst.msk [vmem:[#allocation2 + $0x20] sm:$0xff] %vm440_vm0, %v2427_v33  ;;  %446 = vst.msk [vmem:[#allocation2 + $0x28] sm:$0xff] %vm440_vm0, %v2427_v33 }
  0x2b   : > { %447 = vst.msk [vmem:[#allocation2 + $0x30] sm:$0xff] %vm440_vm0, %v2427_v33  ;;  %448 = vst.msk [vmem:[#allocation2 + $0x38] sm:$0xff] %vm440_vm0, %v2427_v33 }
  0x2c   : > { %449 = vst.msk [vmem:[#allocation2 + $0x40] sm:$0xff] %vm440_vm0, %v2427_v33  ;;  %450 = vst.msk [vmem:[#allocation2 + $0x48] sm:$0xff] %vm440_vm0, %v2427_v33 }
  0x2d   : > { %451 = vst.msk [vmem:[#allocation2 + $0x50] sm:$0xff] %vm440_vm0, %v2427_v33  ;;  %452 = vst.msk [vmem:[#allocation2 + $0x58] sm:$0xff] %vm440_vm0, %v2427_v33 }
  0x2e   : > { %453 = vst.msk [vmem:[#allocation2 + $0x60] sm:$0xff] %vm440_vm0, %v2427_v33  ;;  %454 = vst.msk [vmem:[#allocation2 + $0x68] sm:$0xff] %vm440_vm0, %v2427_v33 }
  0x2f   : > { %455 = vst.msk [vmem:[#allocation2 + $0x70] sm:$0xff] %vm440_vm0, %v2427_v33  ;;  %456 = vst.msk [vmem:[#allocation2 + $0x78] sm:$0xff] %vm440_vm0, %v2427_v33 }
  0x30   : > { %457 = vst.msk [vmem:[#allocation3] sm:$0xff] %vm440_vm0, %v2428_v34  ;;  %458 = vst.msk [vmem:[#allocation3 + $0x8] sm:$0xff] %vm440_vm0, %v2428_v34 }
  0x31   : > { %459 = vst.msk [vmem:[#allocation3 + $0x10] sm:$0xff] %vm440_vm0, %v2428_v34  ;;  %460 = vst.msk [vmem:[#allocation3 + $0x18] sm:$0xff] %vm440_vm0, %v2428_v34 }
  0x32   : > { %461 = vst.msk [vmem:[#allocation3 + $0x20] sm:$0xff] %vm440_vm0, %v2428_v34  ;;  %462 = vst.msk [vmem:[#allocation3 + $0x28] sm:$0xff] %vm440_vm0, %v2428_v34 }
  0x33   : > { %463 = vst.msk [vmem:[#allocation3 + $0x30] sm:$0xff] %vm440_vm0, %v2428_v34  ;;  %464 = vst.msk [vmem:[#allocation3 + $0x38] sm:$0xff] %vm440_vm0, %v2428_v34 }
  0x34   : > { %465 = vst.msk [vmem:[#allocation3 + $0x40] sm:$0xff] %vm440_vm0, %v2428_v34  ;;  %466 = vst.msk [vmem:[#allocation3 + $0x48] sm:$0xff] %vm440_vm0, %v2428_v34 }
  0x35   : > { %467 = vst.msk [vmem:[#allocation3 + $0x50] sm:$0xff] %vm440_vm0, %v2428_v34  ;;  %468 = vst.msk [vmem:[#allocation3 + $0x58] sm:$0xff] %vm440_vm0, %v2428_v34 }
  0x36   : > { %469 = vst.msk [vmem:[#allocation3 + $0x60] sm:$0xff] %vm440_vm0, %v2428_v34  ;;  %470 = vst.msk [vmem:[#allocation3 + $0x68] sm:$0xff] %vm440_vm0, %v2428_v34 }
  0x37   : > { %471 = vst.msk [vmem:[#allocation3 + $0x70] sm:$0xff] %vm440_vm0, %v2428_v34  ;;  %472 = vst.msk [vmem:[#allocation3 + $0x78] sm:$0xff] %vm440_vm0, %v2428_v34 }
  0x38   : > { %473 = vst.msk [vmem:[#allocation4] sm:$0xff] %vm440_vm0, %v2428_v34  ;;  %474 = vst.msk [vmem:[#allocation4 + $0x8] sm:$0xff] %vm440_vm0, %v2428_v34 }
  0x39   : > { %475 = vst.msk [vmem:[#allocation4 + $0x10] sm:$0xff] %vm440_vm0, %v2428_v34  ;;  %476 = vst.msk [vmem:[#allocation4 + $0x18] sm:$0xff] %vm440_vm0, %v2428_v34 }
  0x3a   : > { %477 = vst.msk [vmem:[#allocation4 + $0x20] sm:$0xff] %vm440_vm0, %v2428_v34  ;;  %478 = vst.msk [vmem:[#allocation4 + $0x28] sm:$0xff] %vm440_vm0, %v2428_v34 }
  0x3b   : > { %479 = vst.msk [vmem:[#allocation4 + $0x30] sm:$0xff] %vm440_vm0, %v2428_v34  ;;  %480 = vst.msk [vmem:[#allocation4 + $0x38] sm:$0xff] %vm440_vm0, %v2428_v34 }
  0x3c   : > { %481 = vst.msk [vmem:[#allocation4 + $0x40] sm:$0xff] %vm440_vm0, %v2428_v34  ;;  %482 = vst.msk [vmem:[#allocation4 + $0x48] sm:$0xff] %vm440_vm0, %v2428_v34 }
  0x3d   : > { %483 = vst.msk [vmem:[#allocation4 + $0x50] sm:$0xff] %vm440_vm0, %v2428_v34  ;;  %484 = vst.msk [vmem:[#allocation4 + $0x58] sm:$0xff] %vm440_vm0, %v2428_v34 }
  0x3e   : > { %485 = vst.msk [vmem:[#allocation4 + $0x60] sm:$0xff] %vm440_vm0, %v2428_v34  ;;  %486 = vst.msk [vmem:[#allocation4 + $0x68] sm:$0xff] %vm440_vm0, %v2428_v34 }
  0x3f   : > { %487 = vst.msk [vmem:[#allocation4 + $0x70] sm:$0xff] %vm440_vm0, %v2428_v34  ;;  %488 = vst.msk [vmem:[#allocation4 + $0x78] sm:$0xff] %vm440_vm0, %v2428_v34 }
  0x40   : > { %489 = vst.msk [vmem:[#allocation5] sm:$0xff] %vm440_vm0, %v2428_v34  ;;  %490 = vst.msk [vmem:[#allocation5 + $0x8] sm:$0xff] %vm440_vm0, %v2428_v34 }
  0x41   : > { %491 = vst.msk [vmem:[#allocation5 + $0x10] sm:$0xff] %vm440_vm0, %v2428_v34  ;;  %492 = vst.msk [vmem:[#allocation5 + $0x18] sm:$0xff] %vm440_vm0, %v2428_v34 }
  0x42   : > { %493 = vst.msk [vmem:[#allocation5 + $0x20] sm:$0xff] %vm440_vm0, %v2428_v34  ;;  %494 = vst.msk [vmem:[#allocation5 + $0x28] sm:$0xff] %vm440_vm0, %v2428_v34 }
  0x43   : > { %495 = vst.msk [vmem:[#allocation5 + $0x30] sm:$0xff] %vm440_vm0, %v2428_v34  ;;  %496 = vst.msk [vmem:[#allocation5 + $0x38] sm:$0xff] %vm440_vm0, %v2428_v34 }
  0x44   : > { %497 = vst.msk [vmem:[#allocation5 + $0x40] sm:$0xff] %vm440_vm0, %v2428_v34  ;;  %498 = vst.msk [vmem:[#allocation5 + $0x48] sm:$0xff] %vm440_vm0, %v2428_v34 }
  0x45   : > { %499 = vst.msk [vmem:[#allocation5 + $0x50] sm:$0xff] %vm440_vm0, %v2428_v34  ;;  %500 = vst.msk [vmem:[#allocation5 + $0x58] sm:$0xff] %vm440_vm0, %v2428_v34 }
  0x46   : > { %501 = vst.msk [vmem:[#allocation5 + $0x60] sm:$0xff] %vm440_vm0, %v2428_v34  ;;  %502 = vst.msk [vmem:[#allocation5 + $0x68] sm:$0xff] %vm440_vm0, %v2428_v34 }
  0x47   : > { %503 = vst.msk [vmem:[#allocation5 + $0x70] sm:$0xff] %vm440_vm0, %v2428_v34  ;;  %504 = vst.msk [vmem:[#allocation5 + $0x78] sm:$0xff] %vm440_vm0, %v2428_v34 }
  0x48 PF: > { %v2079_v35 = vcombine.low %v2619_v30, %v2622_v31  ;;  %v2078_v36 = vcombine.low %v2613_v28, %v2616_v29  ;;  %v2064_v37 = vcombine.low %v2518_v0, %v2520_v1  ;;  %v2068_v38 = vcombine.low %v2551_v8, %v2553_v9  ;;  %v1091_v39 = vld [vmem:[%s2516_s21] sm:$0xff]  ;;  %v1092_v40 = vld [vmem:[%s2516_s21 + $0x8] sm:$0xff]  ;;  %v1094_v43 = vld [vmem:[%s2516_s21 + $0x18] sm:$0xff]  ;;  %p2082_p9 = scmp.ne.s32.totalorder %s2409_s24, 1 }
  0x49   : > { %v2429_v41 = vmov 0   ;;  %v2077_v42 = vcombine.low %v2607_v26, %v2610_v27  ;;  %v1093_v44 = vld [vmem:[%s2516_s21 + $0x10] sm:$0xff]  ;;  %v1096_v45 = vld [vmem:[%s2516_s21 + $0x28] sm:$0xff]  ;;  %v1095_v46 = vld [vmem:[%s2516_s21 + $0x20] sm:$0xff]  ;;  %v2076_v47 = vcombine.low %v2601_v24, %v2604_v25  ;;  %v2075_v52 = vcombine.low %v2591_v22, %v2598_v23 }
  0x4a   : > { %2133 = vmatprep.subr.bf16.mxu0 %v2079_v35  ;;  %2165 = vmatprep.subr.bf16.mxu1 %v2079_v35  ;;  %v1098_v48 = vld [vmem:[%s2516_s21 + $0x38] sm:$0xff]  ;;  %v1097_v49 = vld [vmem:[%s2516_s21 + $0x30] sm:$0xff]  ;;  %v1100_v50 = vld [vmem:[%s2516_s21 + $0x48] sm:$0xff]  ;;  %v2074_v57 = vcombine.low %v2585_v20, %v2588_v21  ;;  %v2073_v60 = vcombine.low %v2579_v18, %v2582_v19  ;;  %v2072_v61 = vcombine.low %v2573_v16, %v2576_v17  ;;  %v717_v24 = vlaneseq }
  0x4b   : > { %2134 = vmatpush3.bf16.xpose.msra.mxu0 %v2079_v35  ;;  %2173 = vmatpush3.bf16.xpose.msra.mxu1 %v2079_v35  ;;  %v1099_v51 = vld [vmem:[%s2516_s21 + $0x40] sm:$0xff]  ;;  %v1102_v53 = vld [vmem:[%s2516_s21 + $0x58] sm:$0xff]  ;;  %v1101_v54 = vld [vmem:[%s2516_s21 + $0x50] sm:$0xff]  ;;  %v2065_v62 = vcombine.low %v2522_v2, %v2527_v3  ;;  %v2069_v63 = vcombine.low %v2555_v10, %v2562_v11  ;;  %v2066_v18 = vcombine.low %v2529_v4, %v2541_v5 }
  0x4c   : > { %2135 = vmatprep.subr.bf16.mxu0 %v2078_v36  ;;  %2166 = vmatprep.subr.bf16.mxu1 %v2078_v36  ;;  %v1104_v55 = vld [vmem:[%s2516_s21 + $0x68] sm:$0xff]  ;;  %v1103_v56 = vld [vmem:[%s2516_s21 + $0x60] sm:$0xff]  ;;  %v1106_v58 = vld [vmem:[%s2516_s21 + $0x78] sm:$0xff]  ;;  %v2070_v19 = vcombine.low %v2564_v12, %v2566_v13  ;;  %v2067_v16 = vcombine.low %v2543_v6, %v2545_v7  ;;  %v2071_v17 = vcombine.low %v2568_v14, %v2570_v15  ;;  %v718_v26 = vshrl.u32 %v717_v24, 7 }
  0x4d   : > { %2149 = vmatprep.mubr.bf16.mxu0 %v2064_v37  ;;  %2157 = vmatprep.mubr.bf16.mxu1 %v2068_v38  ;;  %v1105_v59 = vld [vmem:[%s2516_s21 + $0x70] sm:$0xff]  ;;  %v2756_v30 = vld [vmem:[%s380_s16] ss:$0 sm:$0xff]  ;;  %v2080_v38 = vadd.f32 -1.0, %v2624_v32  ;;  %v2996_v11 = vld [vmem:[#allocation2 + $0x48] sm:$0xff] }
  0x4e   : > { %2225 = vset.pattern.permute.xlu0 %v2429_v41  ;;  %2226 = vset.pattern.permute.xlu1 %v2429_v41  ;;  %v719_v28 = vsub.s32 0, %v718_v26  ;;  %v1198_v14 = vld [vmem:[#allocation4] sm:$0xff]  ;;  %v1208_v10 = vld [vmem:[#allocation4 + $0x50] sm:$0xff]  ;;  %v1201_v7 = vld [vmem:[#allocation4 + $0x18] sm:$0xff] }
  0x4f   : > { %1109 = vperm.xlu0 %2225, %v1091_v39   ;;  %1112 = vperm.xlu1 %2226, %v1092_v40   ;;  %v715_v39 = vmul.f32 1e+09, %v2080_v38  ;;  %v1206_v6 = vld [vmem:[#allocation4 + $0x40] sm:$0xff]  ;;  %v1207_v4 = vld [vmem:[#allocation4 + $0x48] sm:$0xff]  ;;  %v3017_v5 = vld [vmem:[#allocation2 + $0x30] sm:$0xff] }
  0x50   : > { %v2759_v31 = vrot.slane %v2624_v32, %v719_v28  ;;  %3852 = vst [vmem:[#allocation24_spill] sm:$0xff] %v3017_v5  ;;  %v3058_v0 = vld [vmem:[#allocation2 + $0x20] sm:$0xff] }
  0x51   : > { %v2772_v41 = vrot.slane %v715_v39, %v719_v28  ;;  %3859 = vst [vmem:[#allocation31_spill] sm:$0xff] %v3058_v0 }
  0x53   : > { %2136 = vmatpush3.bf16.xpose.msra.mxu0 %v2078_v36  ;;  %2174 = vmatpush3.bf16.xpose.msra.mxu1 %v2078_v36 }
  0x54   : > { %2137 = vmatprep.subr.bf16.mxu0 %v2077_v42  ;;  %2167 = vmatprep.subr.bf16.mxu1 %v2077_v42 }
  0x55   : > { %1118 = vperm.xlu0 %2225, %v1094_v43   ;;  %1115 = vperm.xlu1 %2226, %v1093_v44  }
  0x59   : > { %1124 = vperm.xlu0 %2225, %v1096_v45   ;;  %1121 = vperm.xlu1 %2226, %v1095_v46  }
  0x5b   : > { %2138 = vmatpush3.bf16.xpose.msra.mxu0 %v2077_v42  ;;  %2175 = vmatpush3.bf16.xpose.msra.mxu1 %v2077_v42 }
  0x5c   : > { %2139 = vmatprep.subr.bf16.mxu0 %v2076_v47  ;;  %2168 = vmatprep.subr.bf16.mxu1 %v2076_v47 }
  0x5d   : > { %1130 = vperm.xlu0 %2225, %v1098_v48   ;;  %1127 = vperm.xlu1 %2226, %v1097_v49  }
  0x61   : > { %1136 = vperm.xlu0 %2225, %v1100_v50   ;;  %1133 = vperm.xlu1 %2226, %v1099_v51  }
  0x63   : > { %2140 = vmatpush3.bf16.xpose.msra.mxu0 %v2076_v47  ;;  %2176 = vmatpush3.bf16.xpose.msra.mxu1 %v2076_v47 }
  0x64   : > { %2141 = vmatprep.subr.bf16.mxu0 %v2075_v52  ;;  %2169 = vmatprep.subr.bf16.mxu1 %v2075_v52 }
  0x65   : > { %1142 = vperm.xlu0 %2225, %v1102_v53   ;;  %1139 = vperm.xlu1 %2226, %v1101_v54  }
  0x69   : > { %1148 = vperm.xlu0 %2225, %v1104_v55   ;;  %1145 = vperm.xlu1 %2226, %v1103_v56  }
  0x6b   : > { %2142 = vmatpush3.bf16.xpose.msra.mxu0 %v2075_v52  ;;  %2177 = vmatpush3.bf16.xpose.msra.mxu1 %v2075_v52 }
  0x6c   : > { %2143 = vmatprep.subr.bf16.mxu0 %v2074_v57  ;;  %2170 = vmatprep.subr.bf16.mxu1 %v2074_v57 }
  0x6d   : > { %1154 = vperm.xlu0 %2225, %v1106_v58   ;;  %1151 = vperm.xlu1 %2226, %v1105_v59  }
  0x73   : > { %2144 = vmatpush3.bf16.xpose.msra.mxu0 %v2074_v57  ;;  %2178 = vmatpush3.bf16.xpose.msra.mxu1 %v2074_v57 }
  0x74   : > { %2145 = vmatprep.subr.bf16.mxu0 %v2073_v60  ;;  %2171 = vmatprep.subr.bf16.mxu1 %v2073_v60 }
  0x7b   : > { %2146 = vmatpush3.bf16.xpose.msra.mxu0 %v2073_v60  ;;  %2179 = vmatpush3.bf16.xpose.msra.mxu1 %v2073_v60 }
  0x7c   : > { %2147 = vmatprep.subr.bf16.mxu0 %v2072_v61  ;;  %2172 = vmatprep.subr.bf16.mxu1 %v2072_v61 }
  0x83   : > { %2148 = vmatpush3.bf16.xpose.msra.mxu0 %v2072_v61  ;;  %2180 = vmatpush3.bf16.xpose.msra.mxu1 %v2072_v61 }
  0x8a   : > { %2150 = vmatmul.mubr.bf16.vlgmr.msra.gmra.mxu0 %v2065_v62  ;;  %2158 = vmatmul.mubr.bf16.vlgmr.msra.gmra.mxu1 %v2069_v63 }
  0x8b   : > { %2153 = vmatprep.mubr.bf16.mxu0 %v2066_v18  ;;  %2161 = vmatprep.mubr.bf16.mxu1 %v2070_v19 }
  0x92   : > { %2154 = vmatmul.mubr.bf16.gmra.mxu0 %v2067_v16  ;;  %2162 = vmatmul.mubr.bf16.gmra.mxu1 %v2071_v17 }
  0xca   : > { %v1110_v20 = vpop.permute.xlu0 %1109  ;;  %v2765_v35 = vpop.permute.xlu1 %1112 }
  0xcb   : > { %vm1160_vm2 = vcmp.eq.s32.totalorder %v1110_v20, %v2756_v30  ;;  %vm1161_vm9 = vcmp.eq.s32.totalorder %v2765_v35, %v2756_v30 }
  0xcc   : > { %v2799_v61 = vsel %vm1160_vm2, %v2759_v31, 0.0 }
  0xd0   : > { %v2739_v21 = vpop.permute.xlu0 %1118  ;;  %v1116_v36 = vpop.permute.xlu1 %1115 }
  0xd1   : > { %vm1162_vm3 = vcmp.eq.s32.totalorder %v1116_v36, %v2756_v30  ;;  %vm1163_vm6 = vcmp.eq.s32.totalorder %v2739_v21, %v2756_v30 }
  0xd2   : > { %v2802_v63 = vsel %vm1162_vm3, %v2759_v31, 0.0  ;;  %v2827_v36 = vsel %vm1163_vm6, %v2759_v31, 0.0 }
  0xd4   : > { %v2741_v22 = vpop.permute.xlu0 %1124  ;;  %v2767_v37 = vpop.permute.xlu1 %1121 }
  0xd5   : > { %vm1165_vm13 = vcmp.eq.s32.totalorder %v2741_v22, %v2756_v30  ;;  %vm1164_vm14 = vcmp.eq.s32.totalorder %v2767_v37, %v2756_v30 }
  0xd8   : > { %v2743_v23 = vpop.permute.xlu0 %1130  ;;  %v2770_v40 = vpop.permute.xlu1 %1127 }
  0xd9   : > { %vm1166_vm10 = vcmp.eq.s32.totalorder %v2770_v40, %v2756_v30  ;;  %vm1167_vm11 = vcmp.eq.s32.totalorder %v2743_v23, %v2756_v30 }
  0xda   : > { %v2899_v40 = vsel %vm1167_vm11, %v2759_v31, 0.0 }
  0xdc   : > { %v2745_v25 = vpop.permute.xlu0 %1136  ;;  %v1134_v50 = vpop.permute.xlu1 %1133 }
  0xdd   : > { %vm1168_vm5 = vcmp.eq.s32.totalorder %v1134_v50, %v2756_v30  ;;  %vm1169_vm8 = vcmp.eq.s32.totalorder %v2745_v25, %v2756_v30 }
  0xde   : > { %v2823_v28 = vsel %vm1168_vm5, %v2759_v31, 0.0 }
  0xe0   : > { %v2747_v27 = vpop.permute.xlu0 %1142  ;;  %v1140_v58 = vpop.permute.xlu1 %1139 }
  0xe1   : > { %vm1170_vm4 = vcmp.eq.s32.totalorder %v1140_v58, %v2756_v30  ;;  %vm1171_vm7 = vcmp.eq.s32.totalorder %v2747_v27, %v2756_v30 }
  0xe2   : > { %v2812_v17 = vsel %vm1170_vm4, %v2759_v31, 0.0 }
  0xe4   : > { %v2749_v29 = vpop.permute.xlu0 %1148 }
  0xe5   : > { %vm1173_vm15 = vcmp.eq.s32.totalorder %v2749_v29, %v2756_v30 }
  0xe6   : > { %v2926_v37 = vsel %vm1173_vm15, %v2759_v31, 0.0 }
  0xe8   : > { %v1155_v33 = vpop.permute.xlu0 %1154 }
  0xe9   : > { %vm1175_vm1 = vcmp.eq.s32.totalorder %v1155_v33, %v2756_v30 }
  0xea   : > { %v2763_v34 = vsel %vm1175_vm1, %v2759_v31, 0.0  ;;  %vm1058_vm1 = vcmask 7168  }
 0x14a   : > { %v2151_v42 = vpop.f32.mrf.mxu0  ;;  %v2159_v43 = vpop.f32.mrf.mxu1 }
 0x14b   : > { %v700_v44 = vmul.f32 5.0, %v2151_v42  ;;  %v708_v45 = vmul.f32 5.0, %v2159_v43 }
 0x14c   : > { %v635_v46 = vpop.f32.mrf.mxu0  ;;  %v667_v47 = vpop.f32.mrf.mxu1 }
 0x14d   : > { %v2775_v48 = vadd.f32 %v2772_v41, %v700_v44  ;;  %v2778_v49 = vadd.f32 %v2772_v41, %v708_v45  ;;  %v698_v51 = vmul.f32 5.0, %v635_v46  ;;  %v706_v55 = vmul.f32 5.0, %v667_v47 }
 0x14e   : > { %v2152_v32 = vpop.f32.mrf.mxu0  ;;  %v2160_v52 = vpop.f32.mrf.mxu1  ;;  %v2836_v45 = vsel %vm1171_vm7, %v2759_v31, 0.0 }
 0x14f   : > { %v701_v53 = vmul.f32 5.0, %v2152_v32  ;;  %774 = vmax.xlane.f32.xlu0 %v2778_v49  ;;  %758 = vmax.xlane.f32.xlu1 %v2775_v48  ;;  %v2783_v54 = vadd.f32 %v2772_v41, %v698_v51  ;;  %v709_v57 = vmul.f32 5.0, %v2160_v52  ;;  %v2793_v59 = vadd.f32 %v2772_v41, %v706_v55 }
 0x150   : > { %v670_v62 = vpop.f32.mrf.mxu1  ;;  %v1216_v19 = vmul.f32 %v2802_v63, %v2775_v48  ;;  %v638_v20 = vpop.f32.mrf.mxu0  ;;  %v1224_v26 = vmul.f32 %v2812_v17, %v2778_v49  ;;  %v2850_v52 = vsel %vm1169_vm8, %v2759_v31, 0.0 }
 0x151   : > { %v2786_v56 = vadd.f32 %v2772_v41, %v701_v53  ;;  %v2796_v60 = vadd.f32 %v2772_v41, %v709_v57  ;;  %v707_v18 = vmul.f32 5.0, %v670_v62  ;;  %v1214_v16 = vmul.f32 %v2799_v61, %v2783_v54 }
 0x152   : > { %v2155_v33 = vpop.f32.mrf.mxu0  ;;  %v699_v21 = vmul.f32 5.0, %v638_v20  ;;  %v1222_v38 = vmul.f32 %v2823_v28, %v2793_v59  ;;  %v2163_v42 = vpop.f32.mrf.mxu1 }
 0x153   : > { %754 = vmax.xlane.f32.xlu0 %v2783_v54  ;;  %760 = vmax.xlane.f32.xlu1 %v2786_v56  ;;  %v2818_v24 = vadd.f32 %v2772_v41, %v707_v18  ;;  %v1217_v39 = vmul.f32 %v2827_v36, %v2786_v56  ;;  %v704_v44 = vmul.f32 5.0, %v2155_v33  ;;  %v1225_v46 = vmul.f32 %v2836_v45, %v2796_v60 }
 0x154   : > { %v651_v43 = vpop.f32.mrf.mxu0  ;;  %v2841_v27 = vadd.f32 %v2772_v41, %v699_v21  ;;  %v683_v47 = vpop.f32.mrf.mxu1  ;;  %v712_v32 = vmul.f32 5.0, %v2163_v42 }
 0x155   : > { %v2846_v51 = vadd.f32 %v2772_v41, %v704_v44  ;;  %v1223_v25 = vmul.f32 %v2850_v52, %v2818_v24  ;;  %v1146_v21 = vpop.permute.xlu1 %1145 }
 0x156   : > { %v2156_v50 = vpop.f32.mrf.mxu0  ;;  %v2164_v55 = vpop.f32.mrf.mxu1  ;;  %v2857_v57 = vadd.f32 %v2772_v41, %v712_v32  ;;  %vm1172_vm0 = vcmp.eq.s32.totalorder %v1146_v21, %v2756_v30 }
 0x157   : > { %770 = vmax.xlane.f32.xlu0 %v2793_v59  ;;  %776 = vmax.xlane.f32.xlu1 %v2796_v60  ;;  %v705_v53 = vmul.f32 5.0, %v2156_v50  ;;  %v713_v62 = vmul.f32 5.0, %v2164_v55  ;;  %v2893_v50 = vsel %vm1166_vm10, %v2759_v31, 0.0  ;;  %v2922_v55 = vsel %vm1164_vm14, %v2759_v31, 0.0 }
 0x158   : > { %v654_v18 = vpop.f32.mrf.mxu0  ;;  %v686_v33 = vpop.f32.mrf.mxu1  ;;  %v1220_v23 = vmul.f32 %v2893_v50, %v2846_v51 }
 0x159   : > { %v2861_v58 = vadd.f32 %v2772_v41, %v705_v53  ;;  %v2869_v35 = vadd.f32 %v2772_v41, %v713_v62  ;;  %v703_v20 = vmul.f32 5.0, %v654_v18  ;;  %v1152_v44 = vpop.permute.xlu1 %1151  ;;  %v2913_v53 = vsel %vm1165_vm13, %v2759_v31, 0.0 }
 0x15a   : > { %vm1174_vm12 = vcmp.eq.s32.totalorder %v1152_v44, %v2756_v30  ;;  %v2933_v18 = vsel %vm1172_vm0, %v2759_v31, 0.0  ;;  %v2937_v30 = vld [vmem:[#allocation2 + $0x50] sm:$0xff] }
 0x15b   : > { %1234 = vadd.xlane.f32.xlu0 %v1216_v19  ;;  %1230 = vadd.xlane.f32.xlu1 %v1214_v16  ;;  %v2864_v19 = vsel %vm1161_vm9, %v2759_v31, 0.0  ;;  %v702_v16 = vmul.f32 5.0, %v651_v43  ;;  %v2878_v42 = vadd.f32 %v2772_v41, %v703_v20  ;;  %v711_v43 = vmul.f32 5.0, %v686_v33  ;;  %v2939_v20 = vld [vmem:[#allocation2 + $0x10] sm:$0xff] }
 0x15c   : > { %v2908_v32 = vsel %vm1174_vm12, %v2759_v31, 0.0  ;;  %v2947_v31 = vld [vmem:[#allocation2] sm:$0xff] }
 0x15d   : > { %v1228_v22 = vmul.f32 %v2908_v32, %v2857_v57 }
 0x15f   : > { %1250 = vadd.xlane.f32.xlu0 %v1224_v26  ;;  %772 = vmax.xlane.f32.xlu1 %v2818_v24  ;;  %v1215_v26 = vmul.f32 %v2864_v19, %v2841_v27 }
 0x163   : > { %1246 = vadd.xlane.f32.xlu0 %v1222_v38  ;;  %1236 = vadd.xlane.f32.xlu1 %v1217_v39  ;;  %v2875_v38 = vadd.f32 %v2772_v41, %v702_v16  ;;  %v710_v39 = vmul.f32 5.0, %v683_v47  ;;  %v2890_v47 = vadd.f32 %v2772_v41, %v711_v43  ;;  %v2949_v43 = vld [vmem:[#allocation2 + $0x18] sm:$0xff] }
 0x165   : > { %v1218_v62 = vmul.f32 %v2922_v55, %v2875_v38  ;;  %v1227_v29 = vmul.f32 %v2926_v37, %v2890_v47 }
 0x167   : > { %1252 = vadd.xlane.f32.xlu1 %v1225_v46  ;;  %756 = vmax.xlane.f32.xlu0 %v2841_v27  ;;  %v2887_v46 = vadd.f32 %v2772_v41, %v710_v39  ;;  %v1221_v41 = vmul.f32 %v2899_v40, %v2861_v58 }
 0x169   : > { %v1226_v16 = vmul.f32 %v2933_v18, %v2887_v46 }
 0x16b   : > { %1248 = vadd.xlane.f32.xlu1 %v1223_v25  ;;  %766 = vmax.xlane.f32.xlu0 %v2846_v51  ;;  %v1219_v25 = vmul.f32 %v2913_v53, %v2878_v42 }
 0x16f   : > { %782 = vmax.xlane.f32.xlu0 %v2857_v57  ;;  %768 = vmax.xlane.f32.xlu1 %v2861_v58 }
 0x173   : > { %1232 = vadd.xlane.f32.xlu0 %v1215_v26  ;;  %784 = vmax.xlane.f32.xlu1 %v2869_v35 }
 0x177   : > { %762 = vmax.xlane.f32.xlu0 %v2875_v38  ;;  %764 = vmax.xlane.f32.xlu1 %v2878_v42 }
 0x17b   : > { %778 = vmax.xlane.f32.xlu0 %v2887_v46  ;;  %780 = vmax.xlane.f32.xlu1 %v2890_v47 }
 0x17f   : > { %1242 = vadd.xlane.f32.xlu0 %v1220_v23  ;;  %1244 = vadd.xlane.f32.xlu1 %v1221_v41  ;;  %v1200_v23 = vld [vmem:[#allocation4 + $0x10] sm:$0xff] }
 0x183   : > { %1258 = vadd.xlane.f32.xlu0 %v1228_v22  ;;  %1240 = vadd.xlane.f32.xlu1 %v1219_v25 }
 0x187   : > { %1238 = vadd.xlane.f32.xlu0 %v1218_v62  ;;  %1256 = vadd.xlane.f32.xlu1 %v1227_v29  ;;  %v2966_v29 = vld [vmem:[#allocation2 + $0x40] sm:$0xff] }
 0x18b   : > { %1254 = vadd.xlane.f32.xlu0 %v1226_v16  ;;  %v2968_v16 = vld [vmem:[#allocation2 + $0x58] sm:$0xff] }
 0x1d8   : > { %v775_v26 = vpop.xlane.xlu0 %774  ;;  %v759_v33 = vpop.xlane.xlu1 %758 }
 0x1d9   : > { %v2942_v21 = vmax.f32 %v2937_v30, %v775_v26  ;;  %v2945_v39 = vmax.f32 %v2939_v20, %v759_v33 }
 0x1db   : > { %1085 = vst.msk [vmem:[#allocation2 + $0x50] sm:$0xff] %vm1058_vm1, %v2942_v21  ;;  %1077 = vst.msk [vmem:[#allocation2 + $0x10] sm:$0xff] %vm1058_vm1, %v2945_v39  ;;  %862 = vperm.xlu1 %2226, %v2945_v39  }
 0x1dc   : > { %v755_v41 = vpop.xlane.xlu0 %754  ;;  %v761_v22 = vpop.xlane.xlu1 %760 }
 0x1dd   : > { %v2961_v25 = vmax.f32 %v2947_v31, %v755_v41  ;;  %v2964_v62 = vmax.f32 %v2949_v43, %v761_v22 }
 0x1df   : > { %1075 = vst.msk [vmem:[#allocation2] sm:$0xff] %vm1058_vm1, %v2961_v25  ;;  %1078 = vst.msk [vmem:[#allocation2 + $0x18] sm:$0xff] %vm1058_vm1, %v2964_v62  ;;  %852 = vperm.xlu0 %2225, %v2961_v25   ;;  %902 = vperm.xlu1 %2226, %v2942_v21  }
 0x1e0   : > { %v771_v41 = vpop.xlane.xlu0 %770  ;;  %v777_v22 = vpop.xlane.xlu1 %776 }
 0x1e1   : > { %v2981_v44 = vmax.f32 %v2966_v29, %v771_v41  ;;  %v2984_v26 = vmax.f32 %v2968_v16, %v777_v22 }
 0x1e3   : > { %1083 = vst.msk [vmem:[#allocation2 + $0x40] sm:$0xff] %vm1058_vm1, %v2981_v44  ;;  %1086 = vst.msk [vmem:[#allocation2 + $0x58] sm:$0xff] %vm1058_vm1, %v2984_v26  ;;  %907 = vperm.xlu0 %2225, %v2984_v26   ;;  %892 = vperm.xlu1 %2226, %v2981_v44  }
 0x1e4   : > { %v1235_v41 = vpop.xlane.xlu0 %1234  ;;  %v1231_v22 = vpop.xlane.xlu1 %1230 }
 0x1e5   : > { %v1264_v12 = vadd.f32 %v1235_v41, %v1200_v23  ;;  %v1262_v13 = vadd.f32 %v1231_v22, %v1198_v14 }
 0x1e7   : > { %1280 = vst.msk [vmem:[#allocation4 + $0x10] sm:$0xff] %vm1058_vm1, %v1264_v12  ;;  %1278 = vst.msk [vmem:[#allocation4] sm:$0xff] %vm1058_vm1, %v1262_v13  ;;  %867 = vperm.xlu1 %2226, %v2964_v62  }
 0x1e8   : > { %v1251_v15 = vpop.xlane.xlu0 %1250  ;;  %v773_v33 = vpop.xlane.xlu1 %772 }
 0x1e9   : > { %v1272_v8 = vadd.f32 %v1251_v15, %v1208_v10  ;;  %v3002_v9 = vmax.f32 %v2996_v11, %v773_v33  ;;  %v1209_v10 = vld [vmem:[#allocation4 + $0x58] sm:$0xff]  ;;  %v3010_v15 = vld [vmem:[#allocation2 + $0x8] sm:$0xff] }
 0x1ea   : > { %3850 = vst [vmem:[#allocation22_spill] sm:$0xff] %v3010_v15 }
 0x1eb   : > { %1288 = vst.msk [vmem:[#allocation4 + $0x50] sm:$0xff] %vm1058_vm1, %v1272_v8  ;;  %1084 = vst.msk [vmem:[#allocation2 + $0x48] sm:$0xff] %vm1058_vm1, %v3002_v9  ;;  %897 = vperm.xlu0 %2225, %v3002_v9  }
 0x1ec   : > { %v1247_v12 = vpop.xlane.xlu0 %1246  ;;  %v1237_v13 = vpop.xlane.xlu1 %1236 }
 0x1ed   : > { %v1270_v23 = vadd.f32 %v1247_v12, %v1206_v6  ;;  %v1265_v41 = vadd.f32 %v1237_v13, %v1201_v7  ;;  %v3044_v6 = vld [vmem:[#allocation2 + $0x78] sm:$0xff] }
 0x1ee   : > { %3857 = vst [vmem:[#allocation29_spill] sm:$0xff] %v3044_v6 }
 0x1ef   : > { %1286 = vst.msk [vmem:[#allocation4 + $0x40] sm:$0xff] %vm1058_vm1, %v1270_v23  ;;  %1281 = vst.msk [vmem:[#allocation4 + $0x18] sm:$0xff] %vm1058_vm1, %v1265_v41  ;;  %v3028_v41 = vld [vmem:[#allocation2 + $0x70] sm:$0xff] }
 0x1f0   : > { %v1253_v8 = vpop.xlane.xlu1 %1252  ;;  %v757_v33 = vpop.xlane.xlu0 %756  ;;  %3854 = vst [vmem:[#allocation26_spill] sm:$0xff] %v3028_v41 }
 0x1f1   : > { %v1273_v22 = vadd.f32 %v1253_v8, %v1209_v10  ;;  %v3015_v14 = vmax.f32 %v3010_v15, %v757_v33  ;;  %v3030_v10 = vld [vmem:[#allocation2 + $0x38] sm:$0xff]  ;;  %v1211_v15 = vld [vmem:[#allocation4 + $0x68] sm:$0xff] }
 0x1f2   : > { %3855 = vst [vmem:[#allocation27_spill] sm:$0xff] %v3030_v10 }
 0x1f3   : > { %3851 = vst [vmem:[#allocation23_spill] sm:$0xff] %v3015_v14  ;;  %1289 = vst.msk [vmem:[#allocation4 + $0x58] sm:$0xff] %vm1058_vm1, %v1273_v22  ;;  %857 = vperm.xlu1 %2226, %v3015_v14  }
 0x1f4   : > { %1076 = vst.msk [vmem:[#allocation2 + $0x8] sm:$0xff] %vm1058_vm1, %v3015_v14  ;;  %v1249_v7 = vpop.xlane.xlu1 %1248  ;;  %v767_v12 = vpop.xlane.xlu0 %766  ;;  %v1202_v14 = vld [vmem:[#allocation4 + $0x20] sm:$0xff] }
 0x1f5   : > { %v1271_v13 = vadd.f32 %v1249_v7, %v1207_v4  ;;  %v3026_v23 = vmax.f32 %v3017_v5, %v767_v12  ;;  %v1199_v12 = vld [vmem:[#allocation4 + $0x8] sm:$0xff] }
 0x1f6   : > { %v1203_v5 = vld [vmem:[#allocation4 + $0x28] sm:$0xff] }
 0x1f7   : > { %3853 = vst [vmem:[#allocation25_spill] sm:$0xff] %v3026_v23  ;;  %1287 = vst.msk [vmem:[#allocation4 + $0x48] sm:$0xff] %vm1058_vm1, %v1271_v13  ;;  %882 = vperm.xlu1 %2226, %v3026_v23   ;;  %v3060_v13 = vld [vmem:[#allocation2 + $0x28] sm:$0xff] }
 0x1f8   : > { %1081 = vst.msk [vmem:[#allocation2 + $0x30] sm:$0xff] %vm1058_vm1, %v3026_v23  ;;  %v783_v33 = vpop.xlane.xlu0 %782  ;;  %v769_v22 = vpop.xlane.xlu1 %768  ;;  %3860 = vst [vmem:[#allocation32_spill] sm:$0xff] %v3060_v13  ;;  %v1212_v23 = vld [vmem:[#allocation4 + $0x70] sm:$0xff] }
 0x1f9   : > { %v3039_v4 = vmax.f32 %v3028_v41, %v783_v33  ;;  %v3042_v7 = vmax.f32 %v3030_v10, %v769_v22 }
 0x1fb   : > { %3856 = vst [vmem:[#allocation28_spill] sm:$0xff] %v3039_v4  ;;  %1089 = vst.msk [vmem:[#allocation2 + $0x70] sm:$0xff] %vm1058_vm1, %v3039_v4  ;;  %922 = vperm.xlu1 %2226, %v3039_v4   ;;  %v3076_v4 = vld [vmem:[#allocation2 + $0x68] sm:$0xff] }
 0x1fc   : > { %1082 = vst.msk [vmem:[#allocation2 + $0x38] sm:$0xff] %vm1058_vm1, %v3042_v7  ;;  %v1233_v33 = vpop.xlane.xlu0 %1232  ;;  %v785_v22 = vpop.xlane.xlu1 %784  ;;  %3863 = vst [vmem:[#allocation35_spill] sm:$0xff] %v3076_v4 }
 0x1fd   : > { %v1263_v1 = vadd.f32 %v1233_v33, %v1199_v12  ;;  %v3056_v3 = vmax.f32 %v3044_v6, %v785_v22  ;;  %v3074_v22 = vld [vmem:[#allocation2 + $0x60] sm:$0xff] }
 0x1fe   : > { %3862 = vst [vmem:[#allocation34_spill] sm:$0xff] %v3074_v22 }
 0x1ff   : > { %3858 = vst [vmem:[#allocation30_spill] sm:$0xff] %v3056_v3  ;;  %1279 = vst.msk [vmem:[#allocation4 + $0x8] sm:$0xff] %vm1058_vm1, %v1263_v1  ;;  %927 = vperm.xlu0 %2225, %v3056_v3   ;;  %v1204_v1 = vld [vmem:[#allocation4 + $0x30] sm:$0xff] }
 0x200   : > { %1090 = vst.msk [vmem:[#allocation2 + $0x78] sm:$0xff] %vm1058_vm1, %v3056_v3  ;;  %v763_v2 = vpop.xlane.xlu0 %762  ;;  %v765_v10 = vpop.xlane.xlu1 %764 }
 0x201   : > { %v3069_v12 = vmax.f32 %v3058_v0, %v763_v2  ;;  %v3072_v33 = vmax.f32 %v3060_v13, %v765_v10  ;;  %v1205_v0 = vld [vmem:[#allocation4 + $0x38] sm:$0xff] }
 0x203   : > { %3861 = vst [vmem:[#allocation33_spill] sm:$0xff] %v3069_v12  ;;  %1079 = vst.msk [vmem:[#allocation2 + $0x20] sm:$0xff] %vm1058_vm1, %v3069_v12  ;;  %872 = vperm.xlu1 %2226, %v3069_v12  }
 0x204   : > { %1080 = vst.msk [vmem:[#allocation2 + $0x28] sm:$0xff] %vm1058_vm1, %v3072_v33  ;;  %v779_v2 = vpop.xlane.xlu0 %778  ;;  %v781_v10 = vpop.xlane.xlu1 %780 }
 0x205   : > { %v3088_v3 = vmax.f32 %v3074_v22, %v779_v2  ;;  %v3091_v6 = vmax.f32 %v3076_v4, %v781_v10 }
 0x207   : > { %1087 = vst.msk [vmem:[#allocation2 + $0x60] sm:$0xff] %vm1058_vm1, %v3088_v3  ;;  %1088 = vst.msk [vmem:[#allocation2 + $0x68] sm:$0xff] %vm1058_vm1, %v3091_v6  ;;  %912 = vperm.xlu1 %2226, %v3088_v3  }
 0x208   : > { %v1243_v2 = vpop.xlane.xlu0 %1242  ;;  %v1245_v13 = vpop.xlane.xlu1 %1244 }
 0x209   : > { %v1268_v10 = vadd.f32 %v1243_v2, %v1204_v1  ;;  %v1269_v12 = vadd.f32 %v1245_v13, %v1205_v0 }
 0x20b   : > { %1284 = vst.msk [vmem:[#allocation4 + $0x30] sm:$0xff] %vm1058_vm1, %v1268_v10  ;;  %1285 = vst.msk [vmem:[#allocation4 + $0x38] sm:$0xff] %vm1058_vm1, %v1269_v12  ;;  %887 = vperm.xlu1 %2226, %v3042_v7   ;;  %v1210_v10 = vld [vmem:[#allocation4 + $0x60] sm:$0xff] }
 0x20c   : > { %v1259_v41 = vpop.xlane.xlu0 %1258  ;;  %v1241_v22 = vpop.xlane.xlu1 %1240 }
 0x20d   : > { %v1276_v8 = vadd.f32 %v1259_v41, %v1212_v23  ;;  %v1267_v4 = vadd.f32 %v1241_v22, %v1203_v5  ;;  %v1229_v5 = vmul.f32 %v2763_v34, %v2869_v35 }
 0x20f   : > { %1292 = vst.msk [vmem:[#allocation4 + $0x70] sm:$0xff] %vm1058_vm1, %v1276_v8  ;;  %1283 = vst.msk [vmem:[#allocation4 + $0x28] sm:$0xff] %vm1058_vm1, %v1267_v4  ;;  %877 = vperm.xlu1 %2226, %v3072_v33  }
 0x210   : > { %v1239_v0 = vpop.xlane.xlu0 %1238  ;;  %v1257_v13 = vpop.xlane.xlu1 %1256 }
 0x211   : > { %v1266_v1 = vadd.f32 %v1239_v0, %v1202_v14  ;;  %v1275_v2 = vadd.f32 %v1257_v13, %v1211_v15 }
 0x213   : > { %1282 = vst.msk [vmem:[#allocation4 + $0x20] sm:$0xff] %vm1058_vm1, %v1266_v1  ;;  %1291 = vst.msk [vmem:[#allocation4 + $0x68] sm:$0xff] %vm1058_vm1, %v1275_v2 }
 0x214   : > { %v1255_v12 = vpop.xlane.xlu0 %1254 }
 0x215   : > { %v1274_v23 = vadd.f32 %v1255_v12, %v1210_v10 }
 0x217   : > { %1290 = vst.msk [vmem:[#allocation4 + $0x60] sm:$0xff] %vm1058_vm1, %v1274_v23 }
 0x21e   : > { %1310 = vadd.xlane.f32.xlu0 %v2799_v61 }
 0x222   : > { %1314 = vadd.xlane.f32.xlu0 %v2802_v63 }
 0x226   : > { %1318 = vadd.xlane.f32.xlu0 %v2922_v55 }
 0x22a   : > { %1322 = vadd.xlane.f32.xlu0 %v2893_v50 }
 0x22e   : > { %1326 = vadd.xlane.f32.xlu0 %v2823_v28 }
 0x233   : > { %1260 = vadd.xlane.f32.xlu1 %v1229_v5 }
 0x237   : > { %1312 = vadd.xlane.f32.xlu1 %v2864_v19 }
 0x23b   : > { %1316 = vadd.xlane.f32.xlu1 %v2827_v36 }
 0x23f   : > { %1320 = vadd.xlane.f32.xlu1 %v2913_v53 }
 0x243   : > { %1324 = vadd.xlane.f32.xlu1 %v2899_v40 }
 0x244   : > { %917 = vperm.xlu0 %2225, %v3091_v6  }
 0x247   : > { %1328 = vadd.xlane.f32.xlu1 %v2850_v52 }
 0x24b   : > { %1332 = vadd.xlane.f32.xlu1 %v2836_v45 }
 0x24f   : > { %1336 = vadd.xlane.f32.xlu1 %v2926_v37 }
 0x256   : > { %v863_v61 = vpop.permute.xlu1 %862 }
 0x257   : > { %v932_v63 = vsub.f32 %v2775_v48, %v863_v61 }
 0x259   : > { %v950_v28 = vmul.f32 1.442695, %v932_v63 }
 0x25a   : > { %v853_v50 = vpop.permute.xlu0 %852  ;;  %v903_v19 = vpop.permute.xlu1 %902 }
 0x25b   : > { %v930_v36 = vsub.f32 %v2783_v54, %v853_v50  ;;  %v940_v53 = vsub.f32 %v2778_v49, %v903_v19  ;;  %2227 = vpow2.f32 %v950_v28 }
 0x25d   : > { %v946_v40 = vmul.f32 1.442695, %v930_v36  ;;  %v966_v55 = vmul.f32 1.442695, %v940_v53 }
 0x25e   : > { %v893_v14 = vpop.permute.xlu1 %892  ;;  %v908_v45 = vpop.permute.xlu0 %907 }
 0x25f   : > { %2229 = vpow2.f32 %v946_v40  ;;  %v938_v52 = vsub.f32 %v2793_v59, %v893_v14  ;;  %v941_v48 = vsub.f32 %v2796_v60, %v908_v45 }
 0x260   : > { %2231 = vpow2.f32 %v966_v55 }
 0x261   : > { %v962_v37 = vmul.f32 1.442695, %v938_v52  ;;  %v968_v8 = vmul.f32 1.442695, %v941_v48 }
 0x262   : > { %v868_v15 = vpop.permute.xlu1 %867 }
 0x263   : > { %v933_v41 = vsub.f32 %v2786_v56, %v868_v15  ;;  %1330 = vadd.xlane.f32.xlu0 %v2812_v17  ;;  %2233 = vpow2.f32 %v962_v37 }
 0x265   : > { %v952_v54 = vmul.f32 1.442695, %v933_v41 }
 0x266   : > { %v898_v49 = vpop.permute.xlu0 %897 }
 0x267   : > { %2235 = vpow2.f32 %v952_v54  ;;  %v939_v4 = vsub.f32 %v2818_v24, %v898_v49  ;;  %1334 = vadd.xlane.f32.xlu0 %v2933_v18 }
 0x268   : > { %v2228_v59 = vpop.eup %2227  ;;  %2237 = vpow2.f32 %v968_v8  ;;  %v1294_v8 = vld [vmem:[#allocation5] sm:$0xff] }
 0x269   : > { %v964_v22 = vmul.f32 1.442695, %v939_v4 }
 0x26b   : > { %1014 = vadd.xlane.f32.xlu0 %v2228_v59  ;;  %2239 = vpow2.f32 %v964_v22  ;;  %v1296_v22 = vld [vmem:[#allocation5 + $0x10] sm:$0xff] }
 0x26c   : > { %v2230_v0 = vpop.eup %2229 }
 0x26d   : > { %1010 = vadd.xlane.f32.xlu1 %v2230_v0  ;;  %v2232_v60 = vpop.eup %2231 }
 0x26e   : > { %v858_v13 = vpop.permute.xlu1 %857 }
 0x26f   : > { %v931_v56 = vsub.f32 %v2841_v27, %v858_v13  ;;  %1030 = vadd.xlane.f32.xlu0 %v2232_v60  ;;  %v1298_v60 = vld [vmem:[#allocation5 + $0x20] sm:$0xff] }
 0x270   : > { %v2234_v1 = vpop.eup %2233 }
 0x271   : > { %v948_v17 = vmul.f32 1.442695, %v931_v56 }
 0x272   : > { %v883_v2 = vpop.permute.xlu1 %882 }
 0x273   : > { %2241 = vpow2.f32 %v948_v17  ;;  %v936_v24 = vsub.f32 %v2846_v51, %v883_v2  ;;  %1026 = vadd.xlane.f32.xlu0 %v2234_v1  ;;  %v1300_v17 = vld [vmem:[#allocation5 + $0x30] sm:$0xff]  ;;  %v1302_v2 = vld [vmem:[#allocation5 + $0x40] sm:$0xff] }
 0x274   : > { %v2236_v18 = vpop.eup %2235 }
 0x275   : > { %v958_v10 = vmul.f32 1.442695, %v936_v24  ;;  %1016 = vadd.xlane.f32.xlu1 %v2236_v18  ;;  %v2238_v5 = vpop.eup %2237 }
 0x276   : > { %v923_v12 = vpop.permute.xlu1 %922 }
 0x277   : > { %2243 = vpow2.f32 %v958_v10  ;;  %v944_v23 = vsub.f32 %v2857_v57, %v923_v12  ;;  %v1213_v10 = vld [vmem:[#allocation4 + $0x78] sm:$0xff] }
 0x278   : > { %v2240_v27 = vpop.eup %2239 }
 0x279   : > { %v974_v61 = vmul.f32 1.442695, %v944_v23  ;;  %1032 = vadd.xlane.f32.xlu1 %v2238_v5  ;;  %v1295_v5 = vld [vmem:[#allocation5 + $0x8] sm:$0xff] }
 0x27a   : > { %v928_v40 = vpop.permute.xlu0 %927 }
 0x27b   : > { %2245 = vpow2.f32 %v974_v61  ;;  %v945_v14 = vsub.f32 %v2869_v35, %v928_v40 }
 0x27d   : > { %1028 = vadd.xlane.f32.xlu1 %v2240_v27  ;;  %v976_v15 = vmul.f32 1.442695, %v945_v14 }
 0x27e   : > { %v873_v63 = vpop.permute.xlu1 %872 }
 0x27f   : > { %v934_v28 = vsub.f32 %v2875_v38, %v873_v63 }
 0x280   : > { %v2242_v50 = vpop.eup %2241 }
 0x281   : > { %v954_v19 = vmul.f32 1.442695, %v934_v28  ;;  %1012 = vadd.xlane.f32.xlu0 %v2242_v50 }
 0x282   : > { %v913_v51 = vpop.permute.xlu1 %912 }
 0x283   : > { %2247 = vpow2.f32 %v954_v19  ;;  %v942_v36 = vsub.f32 %v2887_v46, %v913_v51  ;;  %v1297_v19 = vld [vmem:[#allocation5 + $0x18] sm:$0xff] }
 0x284   : > { %v2244_v53 = vpop.eup %2243 }
 0x285   : > { %v970_v55 = vmul.f32 1.442695, %v942_v36  ;;  %1022 = vadd.xlane.f32.xlu0 %v2244_v53  ;;  %v1299_v53 = vld [vmem:[#allocation5 + $0x28] sm:$0xff] }
 0x286   : > { %v888_v57 = vpop.permute.xlu1 %887 }
 0x287   : > { %2249 = vpow2.f32 %v970_v55  ;;  %v937_v52 = vsub.f32 %v2861_v58, %v888_v57  ;;  %v1301_v57 = vld [vmem:[#allocation5 + $0x38] sm:$0xff] }
 0x288   : > { %v2246_v45 = vpop.eup %2245 }
 0x289   : > { %v960_v37 = vmul.f32 1.442695, %v937_v52  ;;  %1038 = vadd.xlane.f32.xlu0 %v2246_v45 }
 0x28a   : > { %v878_v38 = vpop.permute.xlu1 %877 }
 0x28b   : > { %2251 = vpow2.f32 %v960_v37  ;;  %v935_v48 = vsub.f32 %v2878_v42, %v878_v38 }
 0x28c   : > { %2253 = vpow2.f32 %v976_v15  ;;  %v1305_v15 = vld [vmem:[#allocation5 + $0x58] sm:$0xff] }
 0x28d   : > { %v956_v46 = vmul.f32 1.442695, %v935_v48 }
 0x28f   : > { %2255 = vpow2.f32 %v956_v46 }
 0x290   : > { %v2248_v41 = vpop.eup %2247 }
 0x291   : > { %1018 = vadd.xlane.f32.xlu0 %v2248_v41  ;;  %v1307_v41 = vld [vmem:[#allocation5 + $0x68] sm:$0xff] }
 0x294   : > { %v2250_v54 = vpop.eup %2249 }
 0x295   : > { %1034 = vadd.xlane.f32.xlu0 %v2250_v54 }
 0x298   : > { %v2252_v49 = vpop.eup %2251 }
 0x299   : > { %1338 = vadd.xlane.f32.xlu0 %v2908_v32  ;;  %1024 = vadd.xlane.f32.xlu1 %v2252_v49  ;;  %v2254_v58 = vpop.eup %2253 }
 0x29c   : > { %v2256_v35 = vpop.eup %2255 }
 0x29d   : > { %1040 = vadd.xlane.f32.xlu1 %v2254_v58  ;;  %v3864_v58 = vsub.f32 %v2939_v20, %v2945_v39  ;;  %v1304_v39 = vld [vmem:[#allocation5 + $0x50] sm:$0xff] }
 0x2a1   : > { %1020 = vadd.xlane.f32.xlu1 %v2256_v35  ;;  %v822_v35 = vmul.f32 1.442695, %v3864_v58 }
 0x2a7   : > { %v1311_v4 = vpop.xlane.xlu0 %1310 }
 0x2a8   : > { %v1342_v59 = vadd.f32 %v1311_v4, %v1294_v8  ;;  %v3865_v8 = vsub.f32 %v2947_v31, %v2961_v25  ;;  %v3869_v31 = vsub.f32 %v2968_v16, %v2984_v26  ;;  %v1306_v25 = vld [vmem:[#allocation5 + $0x60] sm:$0xff] }
 0x2aa   : > { %1358 = vst.msk [vmem:[#allocation5] sm:$0xff] %vm1058_vm1, %v1342_v59  ;;  %v818_v4 = vmul.f32 1.442695, %v3865_v8  ;;  %v3866_v59 = vsub.f32 %v2937_v30, %v2942_v21  ;;  %v840_v30 = vmul.f32 1.442695, %v3869_v31  ;;  %v987_v8 = vld [vmem:[#allocation3 + $0x48] sm:$0xff] }
 0x2ab   : > { %v1315_v42 = vpop.xlane.xlu0 %1314 }
 0x2ac   : > { %v1344_v0 = vadd.f32 %v1315_v42, %v1296_v22  ;;  %v838_v22 = vmul.f32 1.442695, %v3866_v59  ;;  %v3880_v59 = vld [vmem:[#allocation31_spill] sm:$0xff] }
 0x2ae   : > { %1360 = vst.msk [vmem:[#allocation5 + $0x10] sm:$0xff] %vm1058_vm1, %v1344_v0  ;;  %v3868_v0 = vsub.f32 %v2949_v43, %v2964_v62  ;;  %v3870_v43 = vsub.f32 %v2996_v11, %v3002_v9 }
 0x2af   : > { %v1319_v13 = vpop.xlane.xlu0 %1318 }
 0x2b0   : > { %v1346_v56 = vadd.f32 %v1319_v13, %v1298_v60  ;;  %v824_v20 = vmul.f32 1.442695, %v3868_v0  ;;  %v836_v62 = vmul.f32 1.442695, %v3870_v43  ;;  %v984_v43 = vld [vmem:[#allocation3 + $0x30] sm:$0xff] }
 0x2b2   : > { %1362 = vst.msk [vmem:[#allocation5 + $0x20] sm:$0xff] %vm1058_vm1, %v1346_v56 }
 0x2b3   : > { %v1323_v32 = vpop.xlane.xlu0 %1322 }
 0x2b4   : > { %v1348_v1 = vadd.f32 %v1323_v32, %v1300_v17  ;;  %v978_v32 = vld [vmem:[#allocation3] sm:$0xff] }
 0x2b6   : > { %1364 = vst.msk [vmem:[#allocation5 + $0x30] sm:$0xff] %vm1058_vm1, %v1348_v1 }
 0x2b7   : > { %v1327_v24 = vpop.xlane.xlu0 %1326 }
 0x2b8   : > { %v1350_v18 = vadd.f32 %v1327_v24, %v1302_v2  ;;  %v988_v2 = vld [vmem:[#allocation3 + $0x50] sm:$0xff]  ;;  %v3871_v24 = vld [vmem:[#allocation22_spill] sm:$0xff] }
 0x2ba   : > { %1366 = vst.msk [vmem:[#allocation5 + $0x40] sm:$0xff] %vm1058_vm1, %v1350_v18  ;;  %v3872_v18 = vld [vmem:[#allocation23_spill] sm:$0xff] }
 0x2bc   : > { %v1261_v12 = vpop.xlane.xlu1 %1260 }
 0x2bd   : > { %v1277_v23 = vadd.f32 %v1261_v12, %v1213_v10  ;;  %v3873_v10 = vsub.f32 %v3871_v24, %v3872_v18  ;;  %v3887_v24 = vld [vmem:[#allocation29_spill] sm:$0xff]  ;;  %v3888_v18 = vld [vmem:[#allocation30_spill] sm:$0xff] }
 0x2bf   : > { %1293 = vst.msk [vmem:[#allocation4 + $0x78] sm:$0xff] %vm1058_vm1, %v1277_v23  ;;  %v918_v61 = vpop.permute.xlu0 %917  ;;  %v820_v12 = vmul.f32 1.442695, %v3873_v10  ;;  %v3889_v10 = vsub.f32 %v3887_v24, %v3888_v18 }
 0x2c0   : > { %v943_v27 = vsub.f32 %v2890_v47, %v918_v61  ;;  %v1313_v63 = vpop.xlane.xlu1 %1312  ;;  %v1303_v47 = vld [vmem:[#allocation5 + $0x48] sm:$0xff] }
 0x2c1   : > { %v1343_v28 = vadd.f32 %v1313_v63, %v1295_v5 }
 0x2c2   : > { %v972_v50 = vmul.f32 1.442695, %v943_v27 }
 0x2c3   : > { %1359 = vst.msk [vmem:[#allocation5 + $0x8] sm:$0xff] %vm1058_vm1, %v1343_v28  ;;  %v986_v28 = vld [vmem:[#allocation3 + $0x40] sm:$0xff] }
 0x2c4   : > { %2257 = vpow2.f32 %v972_v50  ;;  %v1317_v51 = vpop.xlane.xlu1 %1316  ;;  %v3874_v50 = vld [vmem:[#allocation24_spill] sm:$0xff] }
 0x2c5   : > { %v1345_v36 = vadd.f32 %v1317_v51, %v1297_v19  ;;  %2259 = vpow2.f32 %v822_v35  ;;  %v3875_v19 = vld [vmem:[#allocation25_spill] sm:$0xff] }
 0x2c6   : > { %2261 = vpow2.f32 %v818_v4  ;;  %v3876_v51 = vsub.f32 %v3874_v50, %v3875_v19 }
 0x2c7   : > { %1361 = vst.msk [vmem:[#allocation5 + $0x18] sm:$0xff] %vm1058_vm1, %v1345_v36  ;;  %2263 = vpow2.f32 %v838_v22  ;;  %v3881_v22 = vld [vmem:[#allocation33_spill] sm:$0xff] }
 0x2c8   : > { %v1321_v40 = vpop.xlane.xlu1 %1320  ;;  %v830_v36 = vmul.f32 1.442695, %v3876_v51  ;;  %v990_v51 = vld [vmem:[#allocation3 + $0x60] sm:$0xff] }
 0x2c9   : > { %v1347_v55 = vadd.f32 %v1321_v40, %v1299_v53 }
 0x2cb   : > { %1363 = vst.msk [vmem:[#allocation5 + $0x28] sm:$0xff] %vm1058_vm1, %v1347_v55  ;;  %v981_v55 = vld [vmem:[#allocation3 + $0x18] sm:$0xff] }
 0x2cc   : > { %v1325_v14 = vpop.xlane.xlu1 %1324 }
 0x2cd   : > { %v1349_v52 = vadd.f32 %v1325_v14, %v1301_v57 }
 0x2cf   : > { %1365 = vst.msk [vmem:[#allocation5 + $0x38] sm:$0xff] %vm1058_vm1, %v1349_v52  ;;  %v3877_v52 = vld [vmem:[#allocation26_spill] sm:$0xff] }
 0x2d0   : > { %v1329_v45 = vpop.xlane.xlu1 %1328 }
 0x2d1   : > { %v2258_v37 = vpop.eup %2257  ;;  %v1351_v38 = vadd.f32 %v1329_v45, %v1303_v47  ;;  %v3878_v47 = vld [vmem:[#allocation28_spill] sm:$0xff] }
 0x2d2   : > { %1036 = vadd.xlane.f32.xlu1 %v2258_v37  ;;  %v2260_v13 = vpop.eup %2259  ;;  %v3879_v45 = vsub.f32 %v3877_v52, %v3878_v47  ;;  %v1308_v52 = vld [vmem:[#allocation5 + $0x70] sm:$0xff] }
 0x2d3   : > { %1367 = vst.msk [vmem:[#allocation5 + $0x48] sm:$0xff] %vm1058_vm1, %v1351_v38  ;;  %v2262_v17 = vpop.eup %2261 }
 0x2d4   : > { %v1333_v48 = vpop.xlane.xlu1 %1332  ;;  %v2264_v16 = vpop.eup %2263  ;;  %v994_v5 = vmul.f32 %v2262_v17, %v978_v32  ;;  %v846_v37 = vmul.f32 1.442695, %v3879_v45 }
 0x2d5   : > { %v1353_v46 = vadd.f32 %v1333_v48, %v1305_v15  ;;  %v1004_v11 = vmul.f32 %v2264_v16, %v988_v2  ;;  %v992_v2 = vld [vmem:[#allocation3 + $0x70] sm:$0xff] }
 0x2d6   : > { %1340 = vadd.xlane.f32.xlu1 %v2763_v34  ;;  %v3867_v34 = vsub.f32 %v2966_v29, %v2981_v44  ;;  %v980_v44 = vld [vmem:[#allocation3 + $0x10] sm:$0xff] }
 0x2d7   : > { %1369 = vst.msk [vmem:[#allocation5 + $0x58] sm:$0xff] %vm1058_vm1, %v1353_v46  ;;  %v996_v1 = vmul.f32 %v2260_v13, %v980_v44 }
 0x2d8   : > { %v1337_v54 = vpop.xlane.xlu1 %1336  ;;  %v834_v42 = vmul.f32 1.442695, %v3867_v34  ;;  %v3882_v34 = vsub.f32 %v3880_v59, %v3881_v22  ;;  %v3892_v59 = vld [vmem:[#allocation35_spill] sm:$0xff] }
 0x2d9   : > { %v1355_v49 = vadd.f32 %v1337_v54, %v1307_v41  ;;  %v989_v41 = vld [vmem:[#allocation3 + $0x58] sm:$0xff]  ;;  %v3893_v22 = vsub.f32 %v3892_v59, %v3091_v6 }
 0x2da   : > { %2265 = vpow2.f32 %v834_v42  ;;  %v826_v42 = vmul.f32 1.442695, %v3882_v34 }
 0x2db   : > { %1371 = vst.msk [vmem:[#allocation5 + $0x68] sm:$0xff] %vm1058_vm1, %v1355_v49  ;;  %2267 = vpow2.f32 %v824_v20  ;;  %v844_v34 = vmul.f32 1.442695, %v3893_v22 }
 0x2dc   : > { %2269 = vpow2.f32 %v840_v30  ;;  %v3883_v30 = vld [vmem:[#allocation34_spill] sm:$0xff] }
 0x2dd   : > { %2271 = vpow2.f32 %v836_v62 }
 0x2de   : > { %2273 = vpow2.f32 %v820_v12  ;;  %v848_v12 = vmul.f32 1.442695, %v3889_v10 }
 0x2df   : > { %2275 = vpow2.f32 %v830_v36 }
 0x2e0   : > { %2277 = vpow2.f32 %v846_v37 }
 0x2e1   : > { %2279 = vpow2.f32 %v826_v42 }
 0x2e7   : > { %v2266_v27 = vpop.eup %2265 }
 0x2e8   : > { %v2268_v40 = vpop.eup %2267  ;;  %v1002_v57 = vmul.f32 %v2266_v27, %v986_v28 }
 0x2e9   : > { %v997_v15 = vmul.f32 %v2268_v40, %v981_v55  ;;  %v2270_v48 = vpop.eup %2269 }
 0x2ea   : > { %v1005_v49 = vmul.f32 %v2270_v48, %v989_v41  ;;  %v2272_v58 = vpop.eup %2271 }
 0x2eb   : > { %v1003_v0 = vmul.f32 %v2272_v58, %v987_v8  ;;  %v2274_v20 = vpop.eup %2273 }
 0x2ec   : > { %v1331_v60 = vpop.xlane.xlu0 %1330 }
 0x2ed   : > { %v1352_v21 = vadd.f32 %v1331_v60, %v1304_v39  ;;  %v979_v60 = vld [vmem:[#allocation3 + $0x8] sm:$0xff] }
 0x2ee   : > { %v995_v13 = vmul.f32 %v2274_v20, %v979_v60 }
 0x2ef   : > { %1368 = vst.msk [vmem:[#allocation5 + $0x50] sm:$0xff] %vm1058_vm1, %v1352_v21  ;;  %v3884_v21 = vsub.f32 %v3883_v30, %v3088_v3 }
 0x2f0   : > { %v1335_v56 = vpop.xlane.xlu0 %1334 }
 0x2f1   : > { %v1354_v29 = vadd.f32 %v1335_v56, %v1306_v25  ;;  %v842_v25 = vmul.f32 1.442695, %v3884_v21  ;;  %v2276_v56 = vpop.eup %2275 }
 0x2f2   : > { %v2278_v16 = vpop.eup %2277 }
 0x2f3   : > { %1370 = vst.msk [vmem:[#allocation5 + $0x60] sm:$0xff] %vm1058_vm1, %v1354_v29  ;;  %v3885_v29 = vld [vmem:[#allocation27_spill] sm:$0xff]  ;;  %2281 = vpow2.f32 %v842_v25  ;;  %v2280_v27 = vpop.eup %2279 }
 0x2f4   : > { %v1015_v26 = vpop.xlane.xlu0 %1014  ;;  %v3886_v17 = vsub.f32 %v3885_v29, %v3042_v7  ;;  %v3890_v7 = vld [vmem:[#allocation32_spill] sm:$0xff] }
 0x2f5   : > { %v1044_v23 = vadd.f32 %v1015_v26, %v996_v1  ;;  %v1000_v1 = vmul.f32 %v2276_v56, %v984_v43 }
 0x2f6   : > { %v1011_v61 = vpop.xlane.xlu1 %1010  ;;  %v832_v32 = vmul.f32 1.442695, %v3886_v17 }
 0x2f7   : > { %1061 = vst.msk [vmem:[#allocation3 + $0x10] sm:$0xff] %vm1058_vm1, %v1044_v23  ;;  %v1042_v9 = vadd.f32 %v1011_v61, %v994_v5  ;;  %v1008_v23 = vmul.f32 %v2278_v16, %v992_v2 }
 0x2f8   : > { %v1031_v63 = vpop.xlane.xlu0 %1030  ;;  %2283 = vpow2.f32 %v832_v32 }
 0x2f9   : > { %1059 = vst.msk [vmem:[#allocation3] sm:$0xff] %vm1058_vm1, %v1042_v9  ;;  %v1052_v53 = vadd.f32 %v1031_v63, %v1004_v11  ;;  %2285 = vpow2.f32 %v848_v12  ;;  %v3891_v9 = vsub.f32 %v3890_v7, %v3072_v33  ;;  %v982_v63 = vld [vmem:[#allocation3 + $0x20] sm:$0xff] }
 0x2fa   : > { %v998_v28 = vmul.f32 %v2280_v27, %v982_v63 }
 0x2fb   : > { %1069 = vst.msk [vmem:[#allocation3 + $0x50] sm:$0xff] %vm1058_vm1, %v1052_v53  ;;  %v828_v11 = vmul.f32 1.442695, %v3891_v9 }
 0x2fc   : > { %v1027_v14 = vpop.xlane.xlu0 %1026 }
 0x2fd   : > { %v1050_v38 = vadd.f32 %v1027_v14, %v1002_v57  ;;  %2287 = vpow2.f32 %v828_v11  ;;  %v985_v57 = vld [vmem:[#allocation3 + $0x38] sm:$0xff] }
 0x2fe   : > { %v1017_v46 = vpop.xlane.xlu1 %1016  ;;  %2289 = vpow2.f32 %v844_v34 }
 0x2ff   : > { %1067 = vst.msk [vmem:[#allocation3 + $0x40] sm:$0xff] %vm1058_vm1, %v1050_v38  ;;  %v1045_v54 = vadd.f32 %v1017_v46, %v997_v15  ;;  %v993_v38 = vld [vmem:[#allocation3 + $0x78] sm:$0xff] }
 0x300   : > { %v2282_v50 = vpop.eup %2281 }
 0x301   : > { %1062 = vst.msk [vmem:[#allocation3 + $0x18] sm:$0xff] %vm1058_vm1, %v1045_v54  ;;  %v1006_v53 = vmul.f32 %v2282_v50, %v990_v51 }
 0x302   : > { %v1033_v35 = vpop.xlane.xlu1 %1032 }
 0x303   : > { %v1053_v4 = vadd.f32 %v1033_v35, %v1005_v49  ;;  %v983_v49 = vld [vmem:[#allocation3 + $0x28] sm:$0xff] }
 0x305   : > { %1070 = vst.msk [vmem:[#allocation3 + $0x58] sm:$0xff] %vm1058_vm1, %v1053_v4  ;;  %v2284_v40 = vpop.eup %2283 }
 0x306   : > { %v1029_v39 = vpop.xlane.xlu1 %1028  ;;  %v1001_v33 = vmul.f32 %v2284_v40, %v985_v57  ;;  %v2286_v47 = vpop.eup %2285 }
 0x307   : > { %v1051_v31 = vadd.f32 %v1029_v39, %v1003_v0  ;;  %v1009_v46 = vmul.f32 %v2286_v47, %v993_v38  ;;  %v991_v0 = vld [vmem:[#allocation3 + $0x68] sm:$0xff] }
 0x309   : > { %1068 = vst.msk [vmem:[#allocation3 + $0x48] sm:$0xff] %vm1058_vm1, %v1051_v31  ;;  %v1309_v31 = vld [vmem:[#allocation5 + $0x78] sm:$0xff] }
 0x30a   : > { %v1013_v44 = vpop.xlane.xlu0 %1012  ;;  %v2288_v41 = vpop.eup %2287 }
 0x30b   : > { %v1043_v62 = vadd.f32 %v1013_v44, %v995_v13  ;;  %v999_v35 = vmul.f32 %v2288_v41, %v983_v49  ;;  %v2290_v42 = vpop.eup %2289 }
 0x30c   : > { %v1007_v20 = vmul.f32 %v2290_v42, %v991_v0 }
 0x30d   : > { %1060 = vst.msk [vmem:[#allocation3 + $0x8] sm:$0xff] %vm1058_vm1, %v1043_v62 }
 0x30e   : > { %v1023_v26 = vpop.xlane.xlu0 %1022 }
 0x30f   : > { %v1048_v3 = vadd.f32 %v1023_v26, %v1000_v1 }
 0x311   : > { %1065 = vst.msk [vmem:[#allocation3 + $0x30] sm:$0xff] %vm1058_vm1, %v1048_v3 }
 0x312   : > { %v1039_v5 = vpop.xlane.xlu0 %1038 }
 0x313   : > { %v1056_v61 = vadd.f32 %v1039_v5, %v1008_v23 }
 0x315   : > { %1073 = vst.msk [vmem:[#allocation3 + $0x70] sm:$0xff] %vm1058_vm1, %v1056_v61 }
 0x31a   : > { %v1019_v19 = vpop.xlane.xlu0 %1018 }
 0x31b   : > { %v1046_v36 = vadd.f32 %v1019_v19, %v998_v28 }
 0x31d   : > { %1063 = vst.msk [vmem:[#allocation3 + $0x20] sm:$0xff] %vm1058_vm1, %v1046_v36 }
 0x31e   : > { %v1035_v55 = vpop.xlane.xlu0 %1034 }
 0x31f   : > { %v1054_v14 = vadd.f32 %v1035_v55, %v1006_v53 }
 0x321   : > { %1071 = vst.msk [vmem:[#allocation3 + $0x60] sm:$0xff] %vm1058_vm1, %v1054_v14 }
 0x322   : > { %v1339_v45 = vpop.xlane.xlu0 %1338  ;;  %v1025_v37 = vpop.xlane.xlu1 %1024 }
 0x323   : > { %v1356_v15 = vadd.f32 %v1339_v45, %v1308_v52  ;;  %v1049_v48 = vadd.f32 %v1025_v37, %v1001_v33 }
 0x325   : > { %1372 = vst.msk [vmem:[#allocation5 + $0x70] sm:$0xff] %vm1058_vm1, %v1356_v15  ;;  %1066 = vst.msk [vmem:[#allocation3 + $0x38] sm:$0xff] %vm1058_vm1, %v1049_v48 }
 0x326   : > { %v1041_v54 = vpop.xlane.xlu1 %1040 }
 0x327   : > { %v1057_v58 = vadd.f32 %v1041_v54, %v1009_v46 }
 0x329   : > { %1074 = vst.msk [vmem:[#allocation3 + $0x78] sm:$0xff] %vm1058_vm1, %v1057_v58 }
 0x32a   : > { %v1021_v8 = vpop.xlane.xlu1 %1020 }
 0x32b   : > { %v1047_v4 = vadd.f32 %v1021_v8, %v999_v35 }
 0x32d   : > { %1064 = vst.msk [vmem:[#allocation3 + $0x28] sm:$0xff] %vm1058_vm1, %v1047_v4 }
 0x35b   : > { %v1037_v39 = vpop.xlane.xlu1 %1036 }
 0x35c   : > { %v1055_v60 = vadd.f32 %v1037_v39, %v1007_v20 }
 0x35e   : > { %1072 = vst.msk [vmem:[#allocation3 + $0x68] sm:$0xff] %vm1058_vm1, %v1055_v60  ;;  %1377 = sbr.rel (%p2082_p9) target bundleno = 1092 (0x444), region = 52 }
 0x35f   : > { %v1341_v30 = vpop.xlane.xlu1 %1340 }
 0x360   : > { %v1357_v21 = vadd.f32 %v1341_v30, %v1309_v31 }
 0x362   : > { %1373 = vst.msk [vmem:[#allocation5 + $0x78] sm:$0xff] %vm1058_vm1, %v1357_v21 }
 0x363   : > { %v3894_v25 = vld [vmem:[#allocation8_spill] sm:$0xff]  ;;  %v3895_v13 = vld [vmem:[#allocation6_spill] sm:$0xff]  ;;  %v3896_v44 = vld [vmem:[#allocation9_spill] sm:$0xff]  ;;  %v2430_v9 = vmov 0.0  }
 0x364   : > { %v1380_v6 = vunpack.c.l.bf16 %v3894_v25  ;;  %v1378_v56 = vunpack.c.l.bf16 %v3895_v13  ;;  %v1381_v43 = vunpack.c.l.bf16 %v3896_v44  ;;  %v3897_v62 = vld [vmem:[#allocation7_spill] sm:$0xff]  ;;  %v3899_v3 = vld [vmem:[#allocation10_spill] sm:$0xff]  ;;  %v1764_v18 = vld [vmem:[%s2534_s8 + $0x10] sm:$0xff] }
 0x365   : > { %v1379_v29 = vunpack.c.l.bf16 %v3897_v62  ;;  %v3898_v26 = vld [vmem:[#allocation11_spill] sm:$0xff]  ;;  %v1382_v24 = vunpack.c.l.bf16 %v3899_v3  ;;  %v3900_v10 = vld [vmem:[#allocation13_spill] sm:$0xff]  ;;  %v3901_v61 = vld [vmem:[#allocation12_spill] sm:$0xff]  ;;  %vm1780_vm2 = vcmp.ge.f32.partialorder %v1764_v18, 0.5 }
 0x366   : > { %v1396_v17 = vmul.f32 %v1380_v6, %v1380_v6  ;;  %v1394_v32 = vmul.f32 %v1378_v56, %v1378_v56  ;;  %v1397_v1 = vmul.f32 %v1381_v43, %v1381_v43  ;;  %v1383_v2 = vunpack.c.l.bf16 %v3898_v26  ;;  %v3903_v28 = vld [vmem:[#allocation15_spill] sm:$0xff]  ;;  %v3904_v19 = vld [vmem:[#allocation14_spill] sm:$0xff]  ;;  %v3905_v40 = vld [vmem:[#allocation17_spill] sm:$0xff] }
 0x367   : > { %v1395_v16 = vmul.f32 %v1379_v29, %v1379_v29  ;;  %v1385_v12 = vunpack.c.l.bf16 %v3900_v10  ;;  %v1398_v5 = vmul.f32 %v1382_v24, %v1382_v24  ;;  %v1384_v7 = vunpack.c.l.bf16 %v3901_v61  ;;  %v3906_v57 = vld [vmem:[#allocation16_spill] sm:$0xff]  ;;  %v3907_v47 = vld [vmem:[#allocation19_spill] sm:$0xff]  ;;  %v3908_v37 = vld [vmem:[#allocation18_spill] sm:$0xff] }
 0x368   : > { %1414 = vadd.xlane.f32.xlu1 %v1396_v17  ;;  %1410 = vadd.xlane.f32.xlu0 %v1394_v32  ;;  %v1399_v23 = vmul.f32 %v1383_v2, %v1383_v2  ;;  %v3238_v11 = vsel %vm1780_vm2, 1.0, %v2430_v9  ;;  %v1387_v50 = vunpack.c.l.bf16 %v3903_v28  ;;  %v1386_v51 = vunpack.c.l.bf16 %v3904_v19  ;;  %v3909_v46 = vld [vmem:[#allocation21_spill] sm:$0xff]  ;;  %v3910_v54 = vld [vmem:[#allocation20_spill] sm:$0xff]  ;;  %v1762_v8 = vld [vmem:[%s2534_s8] sm:$0xff] }
 0x369   : > { %3902 = vst [vmem:[#allocation36_spill] sm:$0xff] %v3238_v11  ;;  %1876 = vst.msk [vmem:[%s2560_s20 + $0x10] sm:$0xff] %vm1058_vm1, %v3238_v11  ;;  %v1401_v27 = vmul.f32 %v1385_v12, %v1385_v12  ;;  %v1400_v63 = vmul.f32 %v1384_v7, %v1384_v7  ;;  %v1389_v55 = vunpack.c.l.bf16 %v3905_v40  ;;  %v1388_v14 = vunpack.c.l.bf16 %v3906_v57  ;;  %v1765_v59 = vld [vmem:[%s2534_s8 + $0x18] sm:$0xff]  ;;  %v1763_v22 = vld [vmem:[%s2534_s8 + $0x8] sm:$0xff] }
 0x36a   : > { %v1403_v36 = vmul.f32 %v1387_v50, %v1387_v50  ;;  %v1402_v53 = vmul.f32 %v1386_v51, %v1386_v51  ;;  %v1391_v45 = vunpack.c.l.bf16 %v3907_v47  ;;  %v1390_v38 = vunpack.c.l.bf16 %v3908_v37  ;;  %v1767_v0 = vld [vmem:[%s2534_s8 + $0x28] sm:$0xff]  ;;  %v1766_v20 = vld [vmem:[%s2534_s8 + $0x20] sm:$0xff]  ;;  %v1769_v31 = vld [vmem:[%s2534_s8 + $0x38] sm:$0xff] }
 0x36b   : > { %v1405_v52 = vmul.f32 %v1389_v55, %v1389_v55  ;;  %v1404_v33 = vmul.f32 %v1388_v14, %v1388_v14  ;;  %v1393_v41 = vunpack.c.l.bf16 %v3909_v46  ;;  %v1392_v49 = vunpack.c.l.bf16 %v3910_v54  ;;  %v1768_v30 = vld [vmem:[%s2534_s8 + $0x30] sm:$0xff]  ;;  %v1771_v6 = vld [vmem:[%s2534_s8 + $0x48] sm:$0xff]  ;;  %v1770_v13 = vld [vmem:[%s2534_s8 + $0x40] sm:$0xff] }
 0x36c   : > { %1416 = vadd.xlane.f32.xlu1 %v1397_v1  ;;  %1412 = vadd.xlane.f32.xlu0 %v1395_v16  ;;  %v1407_v15 = vmul.f32 %v1391_v45, %v1391_v45  ;;  %v1406_v48 = vmul.f32 %v1390_v38, %v1390_v38  ;;  %vm1778_vm3 = vcmp.ge.f32.partialorder %v1762_v8, 0.5  ;;  %vm1781_vm4 = vcmp.ge.f32.partialorder %v1765_v59, 0.5  ;;  %v1773_v43 = vld [vmem:[%s2534_s8 + $0x58] sm:$0xff]  ;;  %v1772_v62 = vld [vmem:[%s2534_s8 + $0x50] sm:$0xff]  ;;  %v1775_v32 = vld [vmem:[%s2534_s8 + $0x68] sm:$0xff] }
 0x36d   : > { %v1409_v58 = vmul.f32 %v1393_v41, %v1393_v41  ;;  %v1408_v35 = vmul.f32 %v1392_v49, %v1392_v49  ;;  %v3253_v4 = vsel %vm1778_vm3, 1.0, %v2430_v9  ;;  %vm1779_vm5 = vcmp.ge.f32.partialorder %v1763_v22, 0.5  ;;  %v1774_v1 = vld [vmem:[%s2534_s8 + $0x60] sm:$0xff]  ;;  %v1777_v2 = vld [vmem:[%s2534_s8 + $0x78] sm:$0xff]  ;;  %v1776_v3 = vld [vmem:[%s2534_s8 + $0x70] sm:$0xff] }
 0x36e   : > { %3911 = vst [vmem:[#allocation37_spill] sm:$0xff] %v3253_v4  ;;  %1874 = vst.msk [vmem:[%s2560_s20] sm:$0xff] %vm1058_vm1, %v3253_v4  ;;  %v3261_v34 = vsel %vm1781_vm4, 1.0, %v2430_v9  ;;  %v3264_v42 = vsel %vm1779_vm5, 1.0, %v2430_v9  ;;  %vm1783_vm6 = vcmp.ge.f32.partialorder %v1767_v0, 0.5  ;;  %vm1782_vm7 = vcmp.ge.f32.partialorder %v1766_v20, 0.5 }
 0x36f   : > { %3912 = vst [vmem:[#allocation38_spill] sm:$0xff] %v3261_v34  ;;  %3913 = vst [vmem:[#allocation39_spill] sm:$0xff] %v3264_v42  ;;  %v3275_v39 = vsel %vm1783_vm6, 1.0, %v2430_v9  ;;  %v3278_v60 = vsel %vm1782_vm7, 1.0, %v2430_v9  ;;  %vm1785_vm8 = vcmp.ge.f32.partialorder %v1769_v31, 0.5  ;;  %vm1784_vm9 = vcmp.ge.f32.partialorder %v1768_v30, 0.5 }
 0x370   : > { %1420 = vadd.xlane.f32.xlu1 %v1399_v23  ;;  %1418 = vadd.xlane.f32.xlu0 %v1398_v5  ;;  %1877 = vst.msk [vmem:[%s2560_s20 + $0x18] sm:$0xff] %vm1058_vm1, %v3261_v34  ;;  %1875 = vst.msk [vmem:[%s2560_s20 + $0x8] sm:$0xff] %vm1058_vm1, %v3264_v42  ;;  %v3289_v21 = vsel %vm1785_vm8, 1.0, %v2430_v9  ;;  %v3292_v25 = vsel %vm1784_vm9, 1.0, %v2430_v9  ;;  %vm1787_vm10 = vcmp.ge.f32.partialorder %v1771_v6, 0.5  ;;  %vm1786_vm11 = vcmp.ge.f32.partialorder %v1770_v13, 0.5 }
 0x371   : > { %3914 = vst [vmem:[#allocation40_spill] sm:$0xff] %v3275_v39  ;;  %3915 = vst [vmem:[#allocation41_spill] sm:$0xff] %v3278_v60  ;;  %v3303_v56 = vsel %vm1787_vm10, 1.0, %v2430_v9  ;;  %v3306_v44 = vsel %vm1786_vm11, 1.0, %v2430_v9  ;;  %vm1789_vm12 = vcmp.ge.f32.partialorder %v1773_v43, 0.5  ;;  %vm1788_vm13 = vcmp.ge.f32.partialorder %v1772_v62, 0.5 }
 0x372   : > { %1879 = vst.msk [vmem:[%s2560_s20 + $0x28] sm:$0xff] %vm1058_vm1, %v3275_v39  ;;  %1878 = vst.msk [vmem:[%s2560_s20 + $0x20] sm:$0xff] %vm1058_vm1, %v3278_v60  ;;  %v3317_v29 = vsel %vm1789_vm12, 1.0, %v2430_v9  ;;  %v3320_v17 = vsel %vm1788_vm13, 1.0, %v2430_v9  ;;  %vm1791_vm14 = vcmp.ge.f32.partialorder %v1775_v32, 0.5  ;;  %vm1790_vm15 = vcmp.ge.f32.partialorder %v1774_v1, 0.5 }
 0x373   : > { %3916 = vst [vmem:[#allocation42_spill] sm:$0xff] %v3289_v21  ;;  %3917 = vst [vmem:[#allocation43_spill] sm:$0xff] %v3292_v25  ;;  %v3331_v16 = vsel %vm1791_vm14, 1.0, %v2430_v9  ;;  %v3334_v26 = vsel %vm1790_vm15, 1.0, %v2430_v9  ;;  %vm1793_vm0 = vcmp.ge.f32.partialorder %v1777_v2, 0.5  ;;  %vm1792_vm2 = vcmp.ge.f32.partialorder %v1776_v3, 0.5 }
 0x374   : > { %1424 = vadd.xlane.f32.xlu1 %v1401_v27  ;;  %1422 = vadd.xlane.f32.xlu0 %v1400_v63  ;;  %1881 = vst.msk [vmem:[%s2560_s20 + $0x38] sm:$0xff] %vm1058_vm1, %v3289_v21  ;;  %1880 = vst.msk [vmem:[%s2560_s20 + $0x30] sm:$0xff] %vm1058_vm1, %v3292_v25  ;;  %v3345_v24 = vsel %vm1793_vm0, 1.0, %v2430_v9  ;;  %v3351_v18 = vsel %vm1792_vm2, 1.0, %v2430_v9  ;;  %v1604_v10 = vld [vmem:[#allocation5 + $0x10] sm:$0xff]  ;;  %v3356_v23 = vld [vmem:[#allocation5] sm:$0xff] }
 0x375   : > { %3918 = vst [vmem:[#allocation44_spill] sm:$0xff] %v3303_v56  ;;  %3919 = vst [vmem:[#allocation45_spill] sm:$0xff] %v3306_v44  ;;  %v1716_v12 = vmax.f32 %v1604_v10, 1.0  ;;  %v1714_v61 = vmax.f32 %v3356_v23, 1.0  ;;  %v3359_v27 = vld [vmem:[#allocation5 + $0x18] sm:$0xff]  ;;  %v3362_v19 = vld [vmem:[#allocation5 + $0x8] sm:$0xff] }
 0x376   : > { %1883 = vst.msk [vmem:[%s2560_s20 + $0x48] sm:$0xff] %vm1058_vm1, %v3303_v56  ;;  %1882 = vst.msk [vmem:[%s2560_s20 + $0x40] sm:$0xff] %vm1058_vm1, %v3306_v44  ;;  %v1717_v50 = vmax.f32 %v3359_v27, 1.0  ;;  %v1460_v9 = vld [vmem:[#allocation2 + $0x10] sm:$0xff]  ;;  %v1458_v51 = vld [vmem:[#allocation2] sm:$0xff]  ;;  %v3391_v20 = vadd.f32 -1.0, %v1604_v10 }
 0x377   : > { %3920 = vst [vmem:[#allocation46_spill] sm:$0xff] %v3317_v29  ;;  %3921 = vst [vmem:[#allocation47_spill] sm:$0xff] %v3320_v17  ;;  %2291 = vrcp.f32 %v1716_v12  ;;  %v3369_v14 = vld [vmem:[#allocation5 + $0x28] sm:$0xff]  ;;  %v3374_v45 = vld [vmem:[#allocation5 + $0x20] sm:$0xff]  ;;  %v3379_v46 = vmul.f32 %v1604_v10, %v1460_v9 }
 0x378   : > { %1428 = vadd.xlane.f32.xlu1 %v1403_v36  ;;  %1426 = vadd.xlane.f32.xlu0 %v1402_v53  ;;  %1885 = vst.msk [vmem:[%s2560_s20 + $0x58] sm:$0xff] %vm1058_vm1, %v3317_v29  ;;  %1884 = vst.msk [vmem:[%s2560_s20 + $0x50] sm:$0xff] %vm1058_vm1, %v3320_v17  ;;  %v1715_v36 = vmax.f32 %v3362_v19, 1.0  ;;  %2293 = vrcp.f32 %v1714_v61  ;;  %v1719_v47 = vmax.f32 %v3369_v14, 1.0  ;;  %v1461_v41 = vld [vmem:[#allocation2 + $0x18] sm:$0xff]  ;;  %v1459_v54 = vld [vmem:[#allocation2 + $0x8] sm:$0xff] }
 0x379   : > { %3922 = vst [vmem:[#allocation48_spill] sm:$0xff] %v3331_v16  ;;  %3923 = vst [vmem:[#allocation49_spill] sm:$0xff] %v3334_v26  ;;  %2295 = vrcp.f32 %v1717_v50  ;;  %v3393_v31 = vld [vmem:[#allocation4] sm:$0xff]  ;;  %v1463_v30 = vld [vmem:[#allocation2 + $0x28] sm:$0xff]  ;;  %v3401_v3 = vmul.f32 %v3359_v27, %v1461_v41 }
 0x37a   : > { %1887 = vst.msk [vmem:[%s2560_s20 + $0x68] sm:$0xff] %vm1058_vm1, %v3331_v16  ;;  %1886 = vst.msk [vmem:[%s2560_s20 + $0x60] sm:$0xff] %vm1058_vm1, %v3334_v26  ;;  %2297 = vrcp.f32 %v1715_v36  ;;  %v3395_v43 = vld [vmem:[#allocation5 + $0x30] sm:$0xff]  ;;  %v1462_v1 = vld [vmem:[#allocation2 + $0x20] sm:$0xff] }
 0x37b   : > { %3924 = vst [vmem:[#allocation50_spill] sm:$0xff] %v3345_v24  ;;  %1889 = vst.msk [vmem:[%s2560_s20 + $0x78] sm:$0xff] %vm1058_vm1, %v3345_v24  ;;  %v1720_v2 = vmax.f32 %v3395_v43, 1.0  ;;  %v1466_v26 = vld [vmem:[#allocation2 + $0x40] sm:$0xff] }
 0x37c   : > { %1432 = vadd.xlane.f32.xlu1 %v1405_v52  ;;  %1430 = vadd.xlane.f32.xlu0 %v1404_v33  ;;  %3925 = vst [vmem:[#allocation51_spill] sm:$0xff] %v3351_v18  ;;  %1888 = vst.msk [vmem:[%s2560_s20 + $0x70] sm:$0xff] %vm1058_vm1, %v3351_v18  ;;  %v3505_v11 = vld [vmem:[#allocation4 + $0x40] sm:$0xff] }
 0x37d   : > { %3942 = vst [vmem:[#allocation68_spill] sm:$0xff] %v3505_v11  ;;  %v1496_v11 = vld [vmem:[#allocation3 + $0x30] sm:$0xff] }
 0x380   : > { %1436 = vadd.xlane.f32.xlu1 %v1407_v15  ;;  %1434 = vadd.xlane.f32.xlu0 %v1406_v48  ;;  %v1718_v15 = vmax.f32 %v3374_v45, 1.0  ;;  %v3377_v48 = vld [vmem:[#allocation5 + $0x38] sm:$0xff] }
 0x381   : > { %v1721_v49 = vmax.f32 %v3377_v48, 1.0 }
 0x384   : > { %1440 = vadd.xlane.f32.xlu1 %v1409_v58  ;;  %1438 = vadd.xlane.f32.xlu0 %v1408_v35  ;;  %v3382_v58 = vld [vmem:[#allocation4 + $0x10] sm:$0xff]  ;;  %v3385_v35 = vmul.f32 %v3356_v23, %v1458_v51 }
 0x3f1   : > { %v1415_v5 = vpop.xlane.xlu1 %1414  ;;  %v1411_v7 = vpop.xlane.xlu0 %1410 }
 0x3f2   : > { %v1444_v63 = vmul.f32 5.0, %v1415_v5  ;;  %v1442_v28 = vmul.f32 5.0, %v1411_v7  ;;  %v3411_v7 = vld [vmem:[#allocation4 + $0x18] sm:$0xff]  ;;  %v1467_v5 = vld [vmem:[#allocation2 + $0x48] sm:$0xff] }
 0x3f4   : > { %v3365_v53 = vsub.f32 %v1444_v63, %v1460_v9  ;;  %v3367_v40 = vsub.f32 %v1442_v28, %v1458_v51  ;;  %v3414_v63 = vmul.f32 %v3362_v19, %v1459_v54  ;;  %v3416_v9 = vld [vmem:[#allocation5 + $0x48] sm:$0xff] }
 0x3f5   : > { %v1417_v55 = vpop.xlane.xlu1 %1416  ;;  %v1413_v57 = vpop.xlane.xlu0 %1412 }
 0x3f6   : > { %v1510_v52 = vmul.f32 1.442695, %v3365_v53  ;;  %v1506_v33 = vmul.f32 1.442695, %v3367_v40  ;;  %v1445_v37 = vmul.f32 5.0, %v1417_v55  ;;  %v1443_v38 = vmul.f32 5.0, %v1413_v57 }
 0x3f7   : > { %v1723_v55 = vmax.f32 %v3416_v9, 1.0  ;;  %v3421_v57 = vld [vmem:[#allocation5 + $0x40] sm:$0xff] }
 0x3f8   : > { %2299 = vpow2.f32 %v1510_v52  ;;  %v3387_v8 = vsub.f32 %v1445_v37, %v1461_v41  ;;  %v3389_v59 = vsub.f32 %v1443_v38, %v1459_v54  ;;  %v1465_v52 = vld [vmem:[#allocation2 + $0x38] sm:$0xff]  ;;  %v1722_v37 = vmax.f32 %v3421_v57, 1.0  ;;  %v1464_v54 = vld [vmem:[#allocation2 + $0x30] sm:$0xff] }
 0x3f9   : > { %2301 = vpow2.f32 %v1506_v33  ;;  %v1421_v22 = vpop.xlane.xlu1 %1420  ;;  %v1419_v0 = vpop.xlane.xlu0 %1418  ;;  %v3424_v38 = vld [vmem:[#allocation5 + $0x58] sm:$0xff]  ;;  %v3429_v41 = vmul.f32 %v3369_v14, %v1463_v30  ;;  %v3452_v61 = vmul.f32 %v3377_v48, %v1465_v52  ;;  %v3474_v56 = vmul.f32 %v3395_v43, %v1464_v54 }
 0x3fa   : > { %2303 = vrcp.f32 %v1719_v47  ;;  %v1447_v6 = vmul.f32 5.0, %v1421_v22  ;;  %v1446_v13 = vmul.f32 5.0, %v1419_v0  ;;  %v1512_v62 = vmul.f32 1.442695, %v3387_v8  ;;  %3926 = vst [vmem:[#allocation52_spill] sm:$0xff] %v3424_v38  ;;  %v3432_v22 = vpop.eup %2291  ;;  %v1492_v0 = vld [vmem:[#allocation3 + $0x10] sm:$0xff] }
 0x3fb   : > { %v1508_v32 = vmul.f32 1.442695, %v3389_v59  ;;  %2305 = vrcp.f32 %v1718_v15  ;;  %v3449_v15 = vld [vmem:[#allocation4 + $0x38] sm:$0xff]  ;;  %3932 = vst [vmem:[#allocation58_spill] sm:$0xff] %v3474_v56 }
 0x3fc   : > { %v3403_v10 = vsub.f32 %v1447_v6, %v1463_v30  ;;  %v3405_v12 = vsub.f32 %v1446_v13, %v1462_v1  ;;  %2307 = vrcp.f32 %v1721_v49  ;;  %v1725_v49 = vmax.f32 %v3424_v38, 1.0  ;;  %v3434_v6 = vld [vmem:[#allocation4 + $0x8] sm:$0xff] }
 0x3fd   : > { %2309 = vpow2.f32 %v1512_v62  ;;  %v1425_v28 = vpop.xlane.xlu1 %1424  ;;  %v1423_v50 = vpop.xlane.xlu0 %1422  ;;  %v3436_v13 = vld [vmem:[#allocation4 + $0x28] sm:$0xff]  ;;  %v3438_v62 = vld [vmem:[#allocation4 + $0x20] sm:$0xff] }
 0x3fe   : > { %2311 = vpow2.f32 %v1508_v32  ;;  %v1516_v51 = vmul.f32 1.442695, %v3403_v10  ;;  %v1514_v36 = vmul.f32 1.442695, %v3405_v12  ;;  %v1449_v33 = vmul.f32 5.0, %v1425_v28 }
 0x3ff   : > { %2313 = vrcp.f32 %v1720_v2  ;;  %v1448_v47 = vmul.f32 5.0, %v1423_v50  ;;  %v3441_v32 = vmul.f32 %v3374_v45, %v1462_v1  ;;  %v3454_v1 = vld [vmem:[#allocation5 + $0x50] sm:$0xff] }
 0x400   : > { %2315 = vpow2.f32 %v1516_v51  ;;  %v3443_v2 = vsub.f32 %v1449_v33, %v1465_v52  ;;  %v3447_v51 = vpop.eup %2293  ;;  %3927 = vst [vmem:[#allocation53_spill] sm:$0xff] %v3454_v1  ;;  %v1724_v16 = vmax.f32 %v3454_v1, 1.0  ;;  %v1490_v52 = vld [vmem:[#allocation3] sm:$0xff] }
 0x401   : > { %2317 = vpow2.f32 %v1514_v36  ;;  %v3445_v30 = vsub.f32 %v1448_v47, %v1464_v54  ;;  %v1429_v28 = vpop.xlane.xlu1 %1428  ;;  %v1427_v50 = vpop.xlane.xlu0 %1426  ;;  %v3484_v54 = vld [vmem:[#allocation5 + $0x68] sm:$0xff] }
 0x402   : > { %2319 = vrcp.f32 %v1723_v55  ;;  %v1451_v18 = vmul.f32 5.0, %v1429_v28  ;;  %v1450_v24 = vmul.f32 5.0, %v1427_v50  ;;  %v3456_v36 = vpop.eup %2295  ;;  %v1520_v33 = vmul.f32 1.442695, %v3443_v2  ;;  %3935 = vst [vmem:[#allocation61_spill] sm:$0xff] %v3484_v54 }
 0x403   : > { %3928 = vst [vmem:[#allocation54_spill] sm:$0xff] %v3456_v36  ;;  %v1518_v47 = vmul.f32 1.442695, %v3445_v30  ;;  %2321 = vrcp.f32 %v1722_v37  ;;  %v3461_v17 = vpop.eup %2297 }
 0x404   : > { %3929 = vst [vmem:[#allocation55_spill] sm:$0xff] %v3461_v17  ;;  %v3465_v28 = vsub.f32 %v1451_v18, %v1467_v5  ;;  %v3467_v50 = vsub.f32 %v1450_v24, %v1466_v26  ;;  %2323 = vrcp.f32 %v1725_v49  ;;  %v3478_v18 = vld [vmem:[#allocation4 + $0x30] sm:$0xff]  ;;  %v1469_v24 = vld [vmem:[#allocation2 + $0x58] sm:$0xff] }
 0x405   : > { %v2300_v29 = vpop.eup %2299  ;;  %2325 = vpow2.f32 %v1520_v33  ;;  %v1433_v25 = vpop.xlane.xlu1 %1432  ;;  %3933 = vst [vmem:[#allocation59_spill] sm:$0xff] %v3478_v18 }
 0x406   : > { %3930 = vst [vmem:[#allocation56_spill] sm:$0xff] %v3465_v28  ;;  %3931 = vst [vmem:[#allocation57_spill] sm:$0xff] %v3467_v50  ;;  %v1431_v21 = vpop.xlane.xlu0 %1430  ;;  %v2302_v60 = vpop.eup %2301  ;;  %v1540_v55 = vsub.f32 %v1492_v0, %v2300_v29  ;;  %2327 = vpow2.f32 %v1518_v47  ;;  %v1524_v49 = vmul.f32 1.442695, %v3465_v28  ;;  %v1522_v33 = vmul.f32 1.442695, %v3467_v50 }
 0x407   : > { %v3481_v44 = vpop.eup %2303  ;;  %v1538_v39 = vsub.f32 %v1490_v52, %v2302_v60  ;;  %v1453_v37 = vmul.f32 5.0, %v1433_v25  ;;  %2329 = vrcp.f32 %v1724_v16  ;;  %v1493_v29 = vld [vmem:[#allocation3 + $0x18] sm:$0xff]  ;;  %v3489_v0 = vmul.f32 %v3416_v9, %v1467_v5  ;;  %v1491_v60 = vld [vmem:[#allocation3 + $0x8] sm:$0xff]  ;;  %v1468_v5 = vld [vmem:[#allocation2 + $0x50] sm:$0xff] }
 0x408   : > { %3934 = vst [vmem:[#allocation60_spill] sm:$0xff] %v3481_v44  ;;  %v3486_v42 = vpop.eup %2305  ;;  %2331 = vlog2.f32 %v1540_v55  ;;  %v1452_v47 = vmul.f32 5.0, %v1431_v21  ;;  %v1727_v28 = vmax.f32 %v3484_v54, 1.0  ;;  %v3496_v16 = vld [vmem:[#allocation4 + $0x48] sm:$0xff]  ;;  %v3499_v52 = vmul.f32 %v3421_v57, %v1466_v26 }
 0x409   : > { %3936 = vst [vmem:[#allocation62_spill] sm:$0xff] %v3486_v42  ;;  %3937 = vst [vmem:[#allocation63_spill] sm:$0xff] %v3489_v0  ;;  %v3492_v34 = vpop.eup %2307  ;;  %2333 = vlog2.f32 %v1538_v39  ;;  %v3501_v55 = vsub.f32 %v1453_v37, %v1469_v24  ;;  %v1437_v50 = vpop.xlane.xlu1 %1436  ;;  %v1495_v25 = vld [vmem:[#allocation3 + $0x28] sm:$0xff]  ;;  %v3508_v26 = vmul.f32 %v3424_v38, %v1469_v24  ;;  %v3520_v24 = vmul.f32 %v3454_v1, %v1468_v5 }
 0x40a   : > { %3938 = vst [vmem:[#allocation64_spill] sm:$0xff] %v3492_v34  ;;  %3939 = vst [vmem:[#allocation65_spill] sm:$0xff] %v3499_v52  ;;  %v1435_v42 = vpop.xlane.xlu0 %1434  ;;  %v2310_v21 = vpop.eup %2309  ;;  %2335 = vpow2.f32 %v1524_v49  ;;  %v3503_v44 = vsub.f32 %v1452_v47, %v1468_v5  ;;  %v1471_v34 = vld [vmem:[#allocation2 + $0x68] sm:$0xff]  ;;  %v1455_v39 = vmul.f32 5.0, %v1437_v50  ;;  %v1494_v49 = vld [vmem:[#allocation3 + $0x20] sm:$0xff] }
 0x40b   : > { %3940 = vst [vmem:[#allocation66_spill] sm:$0xff] %v3501_v55  ;;  %v1454_v17 = vmul.f32 5.0, %v1435_v42  ;;  %v2312_v36 = vpop.eup %2311  ;;  %v1541_v4 = vsub.f32 %v1493_v29, %v2310_v21  ;;  %2337 = vpow2.f32 %v1522_v33  ;;  %v1528_v37 = vmul.f32 1.442695, %v3501_v55  ;;  %v3515_v50 = vld [vmem:[#allocation4 + $0x58] sm:$0xff]  ;;  %v1470_v29 = vld [vmem:[#allocation2 + $0x60] sm:$0xff] }
 0x40c   : > { %3941 = vst [vmem:[#allocation67_spill] sm:$0xff] %v3503_v44  ;;  %v3511_v56 = vpop.eup %2313  ;;  %v1539_v18 = vsub.f32 %v1491_v60, %v2312_v36  ;;  %2339 = vrcp.f32 %v1727_v28  ;;  %v3517_v42 = vsub.f32 %v1455_v39, %v1471_v34  ;;  %3944 = vst [vmem:[#allocation70_spill] sm:$0xff] %v3520_v24  ;;  %v3523_v33 = vmul.f32 %v3484_v54, %v1471_v34  ;;  %v3529_v39 = vld [vmem:[#allocation4 + $0x50] sm:$0xff]  ;;  %v3532_v0 = vld [vmem:[#allocation4 + $0x68] sm:$0xff] }
 0x40d   : > { %v2316_v21 = vpop.eup %2315  ;;  %2341 = vlog2.f32 %v1541_v4  ;;  %v3525_v55 = vsub.f32 %v1454_v17, %v1470_v29  ;;  %v1441_v36 = vpop.xlane.xlu1 %1440  ;;  %3947 = vst [vmem:[#allocation73_spill] sm:$0xff] %v3529_v39  ;;  %v1526_v4 = vmul.f32 1.442695, %v3503_v44  ;;  %3948 = vst [vmem:[#allocation74_spill] sm:$0xff] %v3532_v0  ;;  %v3534_v5 = vld [vmem:[#allocation5 + $0x60] sm:$0xff]  ;;  %v3553_v54 = vld [vmem:[#allocation2 + $0x78] sm:$0xff] }
 0x40e   : > { %3943 = vst [vmem:[#allocation69_spill] sm:$0xff] %v3517_v42  ;;  %3945 = vst [vmem:[#allocation71_spill] sm:$0xff] %v3523_v33  ;;  %v1439_v60 = vpop.xlane.xlu0 %1438  ;;  %v2318_v38 = vpop.eup %2317  ;;  %2343 = vlog2.f32 %v1539_v18  ;;  %v1543_v47 = vsub.f32 %v1495_v25, %v2316_v21  ;;  %v1532_v18 = vmul.f32 1.442695, %v3517_v42  ;;  %v1497_v21 = vld [vmem:[#allocation3 + $0x38] sm:$0xff]  ;;  %v1457_v44 = vmul.f32 5.0, %v1441_v36 }
 0x40f   : > { %3946 = vst [vmem:[#allocation72_spill] sm:$0xff] %v3525_v55  ;;  %v3536_v34 = vpop.eup %2319  ;;  %v1542_v17 = vsub.f32 %v1494_v49, %v2318_v38  ;;  %2345 = vpow2.f32 %v1528_v37  ;;  %v1530_v28 = vmul.f32 1.442695, %v3525_v55  ;;  %v1456_v1 = vmul.f32 5.0, %v1439_v60 }
 0x410   : > { %v3541_v25 = vpop.eup %2321  ;;  %2347 = vlog2.f32 %v1543_v47  ;;  %v3551_v49 = vmul.f32 %v3534_v5, %v1470_v29  ;;  %v3555_v47 = vld [vmem:[#allocation2 + $0x70] sm:$0xff]  ;;  %v2083_v36 = vadd.f32 -1.0, %v3356_v23  ;;  %v3559_v60 = vsub.f32 %v1457_v44, %v3553_v54 }
 0x411   : > { %v3544_v52 = vpop.eup %2323  ;;  %2349 = vlog2.f32 %v1542_v17  ;;  %v3562_v17 = vsub.f32 %v1456_v1, %v3555_v47  ;;  %v2086_v37 = vadd.f32 -1.0, %v3359_v27  ;;  %v2084_v29 = vadd.f32 -1.0, %v3362_v19 }
 0x412   : > { %3949 = vst [vmem:[#allocation75_spill] sm:$0xff] %v3544_v52  ;;  %v2326_v55 = vpop.eup %2325  ;;  %2351 = vpow2.f32 %v1526_v4  ;;  %3950 = vst [vmem:[#allocation76_spill] sm:$0xff] %v3559_v60  ;;  %v3569_v42 = vadd.f32 -1.0, %v3369_v14  ;;  %v1536_v44 = vmul.f32 1.442695, %v3559_v60  ;;  %v3573_v1 = vadd.f32 -1.0, %v3374_v45 }
 0x413   : > { %3951 = vst [vmem:[#allocation77_spill] sm:$0xff] %v3562_v17  ;;  %v2328_v38 = vpop.eup %2327  ;;  %v1545_v33 = vsub.f32 %v1497_v21, %v2326_v55  ;;  %2353 = vpow2.f32 %v1532_v18  ;;  %v1499_v52 = vld [vmem:[#allocation3 + $0x48] sm:$0xff]  ;;  %v1726_v27 = vmax.f32 %v3534_v5, 1.0  ;;  %v1534_v19 = vmul.f32 1.442695, %v3562_v17  ;;  %v1498_v14 = vld [vmem:[#allocation3 + $0x40] sm:$0xff] }
 0x414   : > { %v3566_v0 = vpop.eup %2329  ;;  %v1544_v23 = vsub.f32 %v1496_v11, %v2328_v38  ;;  %2355 = vpow2.f32 %v1530_v28  ;;  %v3578_v21 = vadd.f32 -1.0, %v3377_v48  ;;  %v3581_v11 = vadd.f32 -1.0, %v3395_v43 }
 0x415   : > { %3952 = vst [vmem:[#allocation78_spill] sm:$0xff] %v3566_v0  ;;  %v2332_v4 = vpop.eup %2331  ;;  %2357 = vlog2.f32 %v1545_v33  ;;  %v3584_v45 = vadd.f32 -1.0, %v3416_v9  ;;  %v3587_v33 = vadd.f32 -1.0, %v3421_v57  ;;  %v3953_v48 = vsub.f32 %v3382_v58, %v3379_v46  ;;  %v1501_v58 = vld [vmem:[#allocation3 + $0x58] sm:$0xff] }
 0x416   : > { %v2334_v55 = vpop.eup %2333  ;;  %v1559_v18 = vmul.f32 0.6931472, %v2332_v4  ;;  %2359 = vlog2.f32 %v1544_v23  ;;  %v3954_v9 = vsub.f32 %v3393_v31, %v3385_v35 }
 0x417   : > { %v2336_v28 = vpop.eup %2335  ;;  %v1555_v38 = vmul.f32 0.6931472, %v2334_v55  ;;  %2361 = vpow2.f32 %v1536_v44  ;;  %v1652_v4 = vsub.f32 %v3953_v48, %v3365_v53  ;;  %v3600_v44 = vld [vmem:[#allocation5 + $0x78] sm:$0xff]  ;;  %v3955_v53 = vsub.f32 %v3411_v7, %v3401_v3  ;;  %v3963_v48 = vld [vmem:[#allocation36_spill] sm:$0xff] }
 0x418   : > { %v2338_v17 = vpop.eup %2337  ;;  %v1684_v43 = vmul.f32 %v3391_v20, %v1559_v18  ;;  %v1547_v60 = vsub.f32 %v1499_v52, %v2336_v28  ;;  %2363 = vpow2.f32 %v1534_v19  ;;  %v1650_v55 = vsub.f32 %v3954_v9, %v3367_v40 }
 0x419   : > { %v3594_v23 = vpop.eup %2339  ;;  %v1682_v57 = vmul.f32 %v2083_v36, %v1555_v38  ;;  %v1546_v0 = vsub.f32 %v1498_v14, %v2338_v17  ;;  %2365 = vrcp.f32 %v1726_v27  ;;  %v1653_v46 = vsub.f32 %v3955_v53, %v3387_v8  ;;  %v3960_v14 = vld [vmem:[#allocation59_spill] sm:$0xff]  ;;  %v3965_v53 = vld [vmem:[#allocation54_spill] sm:$0xff] }
 0x41a   : > { %v2342_v24 = vpop.eup %2341  ;;  %v1700_v39 = vsub.f32 %v1652_v4, %v1684_v43  ;;  %2367 = vlog2.f32 %v1547_v60  ;;  %v1729_v20 = vmax.f32 %v3600_v44, 1.0  ;;  %v3956_v40 = vsub.f32 %v3434_v6, %v3414_v63 }
 0x41b   : > { %v2344_v52 = vpop.eup %2343  ;;  %v1698_v19 = vsub.f32 %v1650_v55, %v1682_v57  ;;  %v1561_v35 = vmul.f32 0.6931472, %v2342_v24  ;;  %2369 = vlog2.f32 %v1546_v0  ;;  %v3957_v8 = vsub.f32 %v3436_v13, %v3429_v41  ;;  %v1500_v0 = vld [vmem:[#allocation3 + $0x50] sm:$0xff]  ;;  %v3964_v57 = vld [vmem:[#allocation37_spill] sm:$0xff] }
 0x41c   : > { %v1651_v31 = vsub.f32 %v3956_v40, %v3389_v59  ;;  %v2346_v36 = vpop.eup %2345  ;;  %v1735_v17 = vmul.f32 %v3432_v22, %v1700_v39  ;;  %v1557_v27 = vmul.f32 0.6931472, %v2344_v52  ;;  %v3958_v7 = vsub.f32 %v3438_v62, %v3441_v32  ;;  %v3961_v62 = vld [vmem:[#allocation58_spill] sm:$0xff] }
 0x41d   : > { %v1655_v3 = vsub.f32 %v3957_v8, %v3403_v10  ;;  %v2348_v60 = vpop.eup %2347  ;;  %v1731_v18 = vmul.f32 %v3447_v51, %v1698_v19  ;;  %v1685_v63 = vmul.f32 %v2086_v37, %v1561_v35  ;;  %v3959_v59 = vsub.f32 %v3449_v15, %v3452_v61  ;;  %v1503_v51 = vld [vmem:[#allocation3 + $0x68] sm:$0xff]  ;;  %v1502_v15 = vld [vmem:[#allocation3 + $0x60] sm:$0xff] }
 0x41e   : > { %v1654_v24 = vsub.f32 %v3958_v7, %v3405_v12  ;;  %v1549_v6 = vsub.f32 %v1501_v58, %v2346_v36  ;;  %v2350_v39 = vpop.eup %2349  ;;  %v1828_v41 = vsub.f32 0.0, %v1735_v17  ;;  %v1683_v10 = vmul.f32 %v2084_v29, %v1557_v27  ;;  %v3966_v35 = vld [vmem:[#allocation55_spill] sm:$0xff]  ;;  %v1505_v17 = vld [vmem:[#allocation3 + $0x78] sm:$0xff] }
 0x41f   : > { %v3625_v22 = vsub.f32 %v3959_v59, %v3443_v2  ;;  %v1565_v13 = vmul.f32 0.6931472, %v2348_v60  ;;  %v3962_v12 = vsub.f32 %v3960_v14, %v3961_v62  ;;  %v2352_v37 = vpop.eup %2351  ;;  %v1826_v28 = vsub.f32 0.0, %v1731_v18  ;;  %v1504_v60 = vld [vmem:[#allocation3 + $0x70] sm:$0xff]  ;;  %v3970_v62 = vld [vmem:[#allocation39_spill] sm:$0xff] }
 0x420   : > { %v1701_v38 = vsub.f32 %v1653_v46, %v1685_v63  ;;  %v1563_v61 = vmul.f32 0.6931472, %v2350_v39  ;;  %2371 = vlog2.f32 %v1549_v6  ;;  %v2354_v2 = vpop.eup %2353  ;;  %v1844_v4 = vmul.f32 %v3963_v48, %v1828_v41  ;;  %v3967_v63 = vld [vmem:[#allocation60_spill] sm:$0xff]  ;;  %v3969_v41 = vld [vmem:[#allocation62_spill] sm:$0xff] }
 0x421   : > { %v3631_v32 = vsub.f32 %v3962_v12, %v3445_v30  ;;  %v1699_v43 = vsub.f32 %v1651_v31, %v1683_v10  ;;  %v1687_v29 = vmul.f32 %v3569_v42, %v1565_v13  ;;  %v1548_v9 = vsub.f32 %v1500_v0, %v2352_v37  ;;  %v2356_v55 = vpop.eup %2355 }
 0x422   : > { %v1842_v30 = vmul.f32 %v3964_v57, %v1826_v28  ;;  %v1737_v58 = vmul.f32 %v3965_v53, %v1701_v38  ;;  %v1686_v52 = vmul.f32 %v3573_v1, %v1563_v61  ;;  %v1551_v19 = vsub.f32 %v1503_v51, %v2354_v2  ;;  %v2358_v46 = vpop.eup %2357  ;;  %1860 = vst.msk [vmem:[%s2539_s12 + $0x10] sm:$0xff] %vm1058_vm1, %v1844_v4  ;;  %v3651_v28 = vld [vmem:[#allocation5 + $0x70] sm:$0xff] }
 0x423   : > { %v1733_v40 = vmul.f32 %v3966_v35, %v1699_v43  ;;  %v1703_v36 = vsub.f32 %v1655_v3, %v1687_v29  ;;  %2373 = vlog2.f32 %v1548_v9  ;;  %v1550_v31 = vsub.f32 %v1502_v15, %v2356_v55  ;;  %v2360_v27 = vpop.eup %2359  ;;  %v3968_v3 = vld [vmem:[#allocation38_spill] sm:$0xff]  ;;  %v3971_v4 = vld [vmem:[#allocation40_spill] sm:$0xff]  ;;  %v3972_v9 = vld [vmem:[#allocation41_spill] sm:$0xff] }
 0x424   : > { %1858 = vst.msk [vmem:[%s2539_s12] sm:$0xff] %vm1058_vm1, %v1842_v30  ;;  %v1829_v42 = vsub.f32 0.0, %v1737_v58  ;;  %v1702_v8 = vsub.f32 %v1654_v24, %v1686_v52  ;;  %v1569_v7 = vmul.f32 0.6931472, %v2358_v46  ;;  %2375 = vlog2.f32 %v1551_v19  ;;  %v2362_v18 = vpop.eup %2361  ;;  %v3973_v57 = vld [vmem:[#allocation64_spill] sm:$0xff]  ;;  %v3975_v19 = vld [vmem:[#allocation63_spill] sm:$0xff] }
 0x425   : > { %v1827_v1 = vsub.f32 0.0, %v1733_v40  ;;  %v1741_v59 = vmul.f32 %v3967_v63, %v1703_v36  ;;  %v1567_v6 = vmul.f32 0.6931472, %v2360_v27  ;;  %2377 = vlog2.f32 %v1550_v31  ;;  %v2364_v0 = vpop.eup %2363  ;;  %v3974_v52 = vld [vmem:[#allocation56_spill] sm:$0xff]  ;;  %v1598_v31 = vld [vmem:[#allocation4 + $0x60] sm:$0xff]  ;;  %v3978_v27 = vld [vmem:[#allocation57_spill] sm:$0xff] }
 0x426   : > { %v1845_v39 = vmul.f32 %v3968_v3, %v1829_v42  ;;  %v1739_v10 = vmul.f32 %v3969_v41, %v1702_v8  ;;  %v1689_v13 = vmul.f32 %v3578_v21, %v1569_v7  ;;  %v1553_v14 = vsub.f32 %v1505_v17, %v2362_v18  ;;  %v3647_v24 = vpop.eup %2365  ;;  %v3977_v40 = vld [vmem:[#allocation52_spill] sm:$0xff]  ;;  %v3980_v42 = vld [vmem:[#allocation65_spill] sm:$0xff]  ;;  %v3982_v63 = vld [vmem:[#allocation42_spill] sm:$0xff] }
 0x427   : > { %v1843_v12 = vmul.f32 %v3970_v62, %v1827_v1  ;;  %v1831_v51 = vsub.f32 0.0, %v1741_v59  ;;  %v1688_v37 = vmul.f32 %v3581_v11, %v1567_v6  ;;  %v1552_v38 = vsub.f32 %v1504_v60, %v2364_v0  ;;  %v2368_v61 = vpop.eup %2367  ;;  %v1601_v60 = vld [vmem:[#allocation4 + $0x78] sm:$0xff] }
 0x428   : > { %1861 = vst.msk [vmem:[%s2539_s12 + $0x18] sm:$0xff] %vm1058_vm1, %v1845_v39  ;;  %v1830_v15 = vsub.f32 0.0, %v1739_v10  ;;  %v1705_v2 = vsub.f32 %v3625_v22, %v1689_v13  ;;  %2379 = vlog2.f32 %v1553_v14  ;;  %v1728_v21 = vmax.f32 %v3651_v28, 1.0  ;;  %v2370_v48 = vpop.eup %2369  ;;  %v3983_v39 = vld [vmem:[#allocation43_spill] sm:$0xff]  ;;  %v3984_v10 = vld [vmem:[#allocation53_spill] sm:$0xff] }
 0x429   : > { %1859 = vst.msk [vmem:[%s2539_s12 + $0x8] sm:$0xff] %vm1058_vm1, %v1843_v12  ;;  %v1847_v43 = vmul.f32 %v3971_v4, %v1831_v51  ;;  %v1704_v11 = vsub.f32 %v3631_v32, %v1688_v37  ;;  %v1573_v29 = vmul.f32 0.6931472, %v2368_v61  ;;  %2381 = vlog2.f32 %v1552_v38  ;;  %v3985_v12 = vld [vmem:[#allocation66_spill] sm:$0xff]  ;;  %v3987_v38 = vld [vmem:[#allocation61_spill] sm:$0xff] }
 0x42a   : > { %v1846_v55 = vmul.f32 %v3972_v9, %v1830_v15  ;;  %v1745_v30 = vmul.f32 %v3973_v57, %v1705_v2  ;;  %v1571_v53 = vmul.f32 0.6931472, %v2370_v48  ;;  %v3665_v22 = vmul.f32 %v3600_v44, %v3553_v54  ;;  %v3979_v54 = vld [vmem:[#allocation68_spill] sm:$0xff]  ;;  %v3989_v9 = vld [vmem:[#allocation67_spill] sm:$0xff]  ;;  %v3991_v57 = vld [vmem:[#allocation70_spill] sm:$0xff] }
 0x42b   : > { %1863 = vst.msk [vmem:[%s2539_s12 + $0x28] sm:$0xff] %vm1058_vm1, %v1847_v43  ;;  %v1743_v58 = vmul.f32 %v3511_v56, %v1704_v11  ;;  %v3976_v46 = vsub.f32 %v3496_v16, %v3975_v19  ;;  %v1691_v35 = vmul.f32 %v3584_v45, %v1573_v29  ;;  %v2094_v36 = vadd.f32 -1.0, %v3977_v40  ;;  %v3994_v19 = vld [vmem:[#allocation75_spill] sm:$0xff] }
 0x42c   : > { %1862 = vst.msk [vmem:[%s2539_s12 + $0x20] sm:$0xff] %vm1058_vm1, %v1846_v55  ;;  %v1833_v17 = vsub.f32 0.0, %v1745_v30  ;;  %v3981_v8 = vsub.f32 %v3979_v54, %v3980_v42  ;;  %v1690_v56 = vmul.f32 %v3587_v33, %v1571_v53  ;;  %2383 = vrcp.f32 %v1729_v20  ;;  %v1600_v33 = vld [vmem:[#allocation4 + $0x70] sm:$0xff]  ;;  %v3990_v55 = vld [vmem:[#allocation73_spill] sm:$0xff]  ;;  %v3997_v40 = vld [vmem:[#allocation71_spill] sm:$0xff] }
 0x42d   : > { %v1659_v32 = vsub.f32 %v3976_v46, %v3974_v52  ;;  %v2372_v16 = vpop.eup %2371  ;;  %v1832_v45 = vsub.f32 0.0, %v1743_v58  ;;  %v1632_v1 = vmul.f32 %v3651_v28, %v3555_v47  ;;  %2385 = vrcp.f32 %v1728_v21  ;;  %v3993_v52 = vld [vmem:[#allocation45_spill] sm:$0xff]  ;;  %v3999_v54 = vld [vmem:[#allocation72_spill] sm:$0xff] }
 0x42e   : > { %v1658_v7 = vsub.f32 %v3981_v8, %v3978_v27  ;;  %v1849_v59 = vmul.f32 %v3982_v63, %v1833_v17  ;;  %v1577_v0 = vmul.f32 0.6931472, %v2372_v16  ;;  %v1646_v3 = vsub.f32 %v1598_v31, %v3551_v49 }
 0x42f   : > { %v1707_v18 = vsub.f32 %v1659_v32, %v1691_v35  ;;  %v1848_v41 = vmul.f32 %v3983_v39, %v1832_v45  ;;  %v2093_v13 = vadd.f32 -1.0, %v3984_v10  ;;  %v1649_v14 = vsub.f32 %v1601_v60, %v3665_v22  ;;  %v3995_v32 = vld [vmem:[#allocation69_spill] sm:$0xff]  ;;  %v3996_v35 = vld [vmem:[#allocation74_spill] sm:$0xff]  ;;  %v4002_v39 = vld [vmem:[#allocation76_spill] sm:$0xff] }
 0x430   : > { %v1706_v6 = vsub.f32 %v1658_v7, %v1690_v56  ;;  %v2374_v62 = vpop.eup %2373  ;;  %1865 = vst.msk [vmem:[%s2539_s12 + $0x38] sm:$0xff] %vm1058_vm1, %v1849_v59  ;;  %v3986_v51 = vsub.f32 %v3515_v50, %v3508_v26  ;;  %v1693_v49 = vmul.f32 %v2094_v36, %v1577_v0  ;;  %v2096_v61 = vadd.f32 -1.0, %v3987_v38  ;;  %v3988_v26 = vld [vmem:[#allocation44_spill] sm:$0xff] }
 0x431   : > { %v1749_v20 = vmul.f32 %v3536_v34, %v1707_v18  ;;  %v2376_v15 = vpop.eup %2375  ;;  %1864 = vst.msk [vmem:[%s2539_s12 + $0x30] sm:$0xff] %vm1058_vm1, %v1848_v41  ;;  %v1575_v2 = vmul.f32 0.6931472, %v2374_v62  ;;  %v2095_v21 = vadd.f32 -1.0, %v3534_v5  ;;  %v1648_v48 = vsub.f32 %v1600_v33, %v1632_v1  ;;  %v4000_v18 = vld [vmem:[#allocation78_spill] sm:$0xff] }
 0x432   : > { %v1747_v47 = vmul.f32 %v3541_v25, %v1706_v6  ;;  %v1661_v37 = vsub.f32 %v3986_v51, %v3985_v12  ;;  %v2378_v4 = vpop.eup %2377  ;;  %v1581_v11 = vmul.f32 0.6931472, %v2376_v15  ;;  %v2098_v29 = vadd.f32 -1.0, %v3600_v44  ;;  %v4001_v6 = vld [vmem:[#allocation46_spill] sm:$0xff] }
 0x433   : > { %v1835_v34 = vsub.f32 0.0, %v1749_v20  ;;  %v3992_v30 = vsub.f32 %v3990_v55, %v3991_v57  ;;  %v1692_v22 = vmul.f32 %v2093_v13, %v1575_v2  ;;  %v1579_v58 = vmul.f32 0.6931472, %v2378_v4  ;;  %v4003_v13 = vld [vmem:[#allocation77_spill] sm:$0xff] }
 0x434   : > { %v1834_v43 = vsub.f32 0.0, %v1747_v47  ;;  %v1709_v25 = vsub.f32 %v1661_v37, %v1693_v49  ;;  %v3998_v36 = vsub.f32 %v3996_v35, %v3997_v40  ;;  %v1695_v44 = vmul.f32 %v2096_v61, %v1581_v11  ;;  %v4005_v61 = vld [vmem:[#allocation48_spill] sm:$0xff]  ;;  %v4008_v11 = vld [vmem:[#allocation51_spill] sm:$0xff] }
 0x435   : > { %v1851_v50 = vmul.f32 %v3988_v26, %v1835_v34  ;;  %v1660_v53 = vsub.f32 %v3992_v30, %v3989_v9  ;;  %v2380_v17 = vpop.eup %2379  ;;  %v1662_v42 = vsub.f32 %v1646_v3, %v3999_v54  ;;  %v1694_v8 = vmul.f32 %v2095_v21, %v1579_v58 }
 0x436   : > { %v1850_v5 = vmul.f32 %v3993_v52, %v1834_v43  ;;  %v1753_v46 = vmul.f32 %v3994_v19, %v1709_v25  ;;  %v1663_v31 = vsub.f32 %v3998_v36, %v3995_v32  ;;  %v2097_v7 = vadd.f32 -1.0, %v3651_v28  ;;  %v2382_v56 = vpop.eup %2381  ;;  %v4007_v43 = vld [vmem:[#allocation50_spill] sm:$0xff] }
 0x437   : > { %1867 = vst.msk [vmem:[%s2539_s12 + $0x48] sm:$0xff] %vm1058_vm1, %v1851_v50  ;;  %v1708_v27 = vsub.f32 %v1660_v53, %v1692_v22  ;;  %v1585_v45 = vmul.f32 0.6931472, %v2380_v17  ;;  %v1710_v63 = vsub.f32 %v1662_v42, %v1694_v8  ;;  %v1583_v59 = vmul.f32 0.6931472, %v2382_v56 }
 0x438   : > { %1866 = vst.msk [vmem:[%s2539_s12 + $0x40] sm:$0xff] %vm1058_vm1, %v1850_v5  ;;  %v1837_v60 = vsub.f32 0.0, %v1753_v46  ;;  %v1711_v16 = vsub.f32 %v1663_v31, %v1695_v44  ;;  %v1665_v3 = vsub.f32 %v1649_v14, %v4002_v39  ;;  %v1664_v62 = vsub.f32 %v1648_v48, %v4003_v13 }
 0x439   : > { %v1751_v1 = vmul.f32 %v4000_v18, %v1708_v27  ;;  %v1697_v41 = vmul.f32 %v2098_v29, %v1585_v45  ;;  %v2384_v28 = vpop.eup %2383  ;;  %v1755_v10 = vmul.f32 %v3647_v24, %v1710_v63  ;;  %v1696_v47 = vmul.f32 %v2097_v7, %v1583_v59  ;;  %v4006_v24 = vld [vmem:[#allocation49_spill] sm:$0xff] }
 0x43a   : > { %v1853_v0 = vmul.f32 %v4001_v6, %v1837_v60  ;;  %v1757_v33 = vmul.f32 %v3594_v23, %v1711_v16  ;;  %v2386_v12 = vpop.eup %2385  ;;  %v4004_v23 = vld [vmem:[#allocation47_spill] sm:$0xff] }
 0x43b   : > { %v1836_v20 = vsub.f32 0.0, %v1751_v1  ;;  %v1713_v37 = vsub.f32 %v1665_v3, %v1697_v41  ;;  %v1838_v49 = vsub.f32 0.0, %v1755_v10  ;;  %v1712_v38 = vsub.f32 %v1664_v62, %v1696_v47 }
 0x43c   : > { %1869 = vst.msk [vmem:[%s2539_s12 + $0x58] sm:$0xff] %vm1058_vm1, %v1853_v0  ;;  %v1839_v51 = vsub.f32 0.0, %v1757_v33 }
 0x43d   : > { %v1852_v14 = vmul.f32 %v4004_v23, %v1836_v20  ;;  %v1761_v34 = vmul.f32 %v2384_v28, %v1713_v37  ;;  %v1854_v2 = vmul.f32 %v4006_v24, %v1838_v49  ;;  %v1759_v21 = vmul.f32 %v2386_v12, %v1712_v38 }
 0x43e   : > { %v1855_v15 = vmul.f32 %v4005_v61, %v1839_v51 }
 0x43f   : > { %1868 = vst.msk [vmem:[%s2539_s12 + $0x50] sm:$0xff] %vm1058_vm1, %v1852_v14  ;;  %v1841_v48 = vsub.f32 0.0, %v1761_v34  ;;  %1870 = vst.msk [vmem:[%s2539_s12 + $0x60] sm:$0xff] %vm1058_vm1, %v1854_v2  ;;  %v1840_v4 = vsub.f32 0.0, %v1759_v21 }
 0x440   : > { %1871 = vst.msk [vmem:[%s2539_s12 + $0x68] sm:$0xff] %vm1058_vm1, %v1855_v15 }
 0x441   : > { %v1857_v25 = vmul.f32 %v4007_v43, %v1841_v48  ;;  %v1856_v29 = vmul.f32 %v4008_v11, %v1840_v4 }
 0x443   : > { %1873 = vst.msk [vmem:[%s2539_s12 + $0x78] sm:$0xff] %vm1058_vm1, %v1857_v25  ;;  %1872 = vst.msk [vmem:[%s2539_s12 + $0x70] sm:$0xff] %vm1058_vm1, %v1856_v29 }
 0x444 PF: > { %s18_s28 = sadd.s32 1, %s2425_s28   ;;  %s4009_s24 = smov %s2417_s26 }
 0x445   : > { %p15_p10 = scmp.ge.s32.totalorder %s18_s28, 6   ;;  %s4010_s25 = smov %s2421_s27 }
 0x446   : > { %s4011_s26 = smov %s4014_s29  ;;  %s4012_s27 = smov %s4018_s30 }
 0x447   :  { %17 = sbr.rel (!%p15_p10) target bundleno = 3 (0x3), region = 109 }

</bundles_post_ra>
